<compile_context>
chip_gen: v5e
topology: v5e:2x2
jax: 0.10.0
libtpu: 0.0.40
codegen_flags: <defaults>
</compile_context>

<pallas_src>
import functools

import jax
import jax.numpy as jnp
from jax import lax
from jax.experimental import pallas as pl
from jax.experimental.pallas import tpu as pltpu


def vae_forward_kernel(
    x_ref, eps_ref,
    w1_ref, b1_ref,
    wms_ref, bms_ref,          # fused [Wmu | Wsig], [bmu | bsig]
    wg1s_ref, bg1_ref,         # stacked decoder-1 weight [Wg1; Wg1]  (2L, H)
    wg2_ref, bg2_ref,
    out_ref,
    *, latent_dim,
):
    """One batch tile of the full VAE forward (encoder + reparam + decoder)."""
    x = x_ref[...]                                            # (TB, D_in) bf16 stream

    # ---- encoder: proposal_z = Linear + LeakyReLU(0.01) ----
    h = jnp.dot(x, w1_ref[...], preferred_element_type=jnp.float32) + b1_ref[...]
    h = jnp.where(h > 0, h, 0.01 * h)

    # ---- fused proposal_mu / proposal_sigma projection (shared LHS) ----
    ms = jnp.dot(h.astype(jnp.bfloat16), wms_ref[...],
                 preferred_element_type=jnp.float32) + bms_ref[...]   # (TB, 2L)

    # numerically-stable softplus on all 2L lanes (lower L lanes discarded by the select)
    sp = jnp.maximum(ms, 0.0) + jnp.log1p(jnp.exp(-jnp.abs(ms)))

    # ---- reparameterization without lane-slicing ----
    # v[:, :L]  = mu
    # v[:, L:]  = eps * softplus(sig_pre)        (eps pre-padded to (TB, 2L) host-side)
    # v @ [Wg1; Wg1] == (mu + eps*sigma) @ Wg1  -> same decoder-1 result, one K=2L matmul.
    lane = lax.broadcasted_iota(jnp.int32, ms.shape, 1)
    v = jnp.where(lane < latent_dim, ms, eps_ref[...] * sp)

    # ---- decoder: Linear + LeakyReLU + Linear + Sigmoid ----
    g = jnp.dot(v.astype(jnp.bfloat16), wg1s_ref[...],
                preferred_element_type=jnp.float32) + bg1_ref[...]
    g = jnp.where(g > 0, g, 0.01 * g)
    o = jnp.dot(g.astype(jnp.bfloat16), wg2_ref[...],
                preferred_element_type=jnp.float32) + bg2_ref[...]
    # stable sigmoid via single EUP tanh: sigmoid(x) = 0.5*tanh(x/2) + 0.5
    o = 0.5 * jnp.tanh(0.5 * o) + 0.5

    # ---- q_x clamp [0.01, 0.99] ----
    out_ref[...] = jnp.clip(o, 0.01, 0.99)


def vae_forward(x, eps2, params, *, tb=None):
    """Batch-tiled pallas_call: x/eps/out streamed per tile, weights VMEM-resident.

    x    : (batch, input_dim) f32 or bf16  (streamed as bf16)
    eps2 : (batch, 2*latent_dim) f32, eps in columns [L:2L] (columns [0:L] ignored)
    """
    (w1, b1, wms, bms, wg1s, bg1, wg2, bg2) = params
    batch, input_dim = x.shape
    latent_dim = eps2.shape[1] // 2
    hidden_dim = w1.shape[1]

    # ---- tile selection: big tiles to amortize per-step overhead, but >=2 grid steps
    # so v7x (2 TensorCores) can shard the "parallel" batch axis across cores. ----
    if tb is None:
        tb = min(1024, pl.cdiv(batch, 2))
    tb = max(16, ((tb + 15) // 16) * 16)          # sublane-align for bf16 x tiles
    padded_batch = pl.cdiv(batch, tb) * tb
    grid = (padded_batch // tb,)

    # stream x as bf16 (halves the dominant HBM input stream); pad ragged batch.
    x = x.astype(jnp.bfloat16)
    eps2 = eps2.astype(jnp.float32)
    if padded_batch != batch:
        pad = padded_batch - batch
        x = jnp.pad(x, ((0, pad), (0, 0)))
        eps2 = jnp.pad(eps2, ((0, pad), (0, 0)))

    batch_map = lambda i: (i, 0)   # stream batch tiles
    const_map = lambda i: (0, 0)   # weights/biases resident across the whole grid

    in_specs = [
        pl.BlockSpec((tb, input_dim), batch_map),        # x  (bf16)
        pl.BlockSpec((tb, 2 * latent_dim), batch_map),   # eps padded to 2L lanes (f32)
        pl.BlockSpec(w1.shape, const_map),
        pl.BlockSpec(b1.shape, const_map),
        pl.BlockSpec(wms.shape, const_map),
        pl.BlockSpec(bms.shape, const_map),
        pl.BlockSpec(wg1s.shape, const_map),
        pl.BlockSpec(bg1.shape, const_map),
        pl.BlockSpec(wg2.shape, const_map),
        pl.BlockSpec(bg2.shape, const_map),
    ]
    # Output kept f32 to match the PyTorch module; bf16 out would save another ~2x
    # output bytes (numerics tradeoff) if downstream code allows it.
    out_specs = pl.BlockSpec((tb, input_dim), batch_map)

    # ---- explicit scoped-VMEM limit sized from the actual footprint (double-buffered
    # streams + resident weights), clamped to [16 MiB, 64 MiB] so large tb sweeps work
    # on v5e (16 MiB scoped default) without exceeding v7x's 64 MiB physical VMEM. ----
    stream_tile_bytes = tb * input_dim * (2 + 4) + tb * 2 * latent_dim * 4
    weight_bytes = (2 * (w1.size + wms.size + wg1s.size + wg2.size)
                    + 4 * (b1.size + bms.size + bg1.size + bg2.size))
    vmem_limit = int(min(64 << 20,
                         max(16 << 20, 4 * stream_tile_bytes + 2 * weight_bytes + (2 << 20))))

    flops = 2 * batch * (input_dim * hidden_dim              # encoder
                         + hidden_dim * 2 * latent_dim       # fused mu/sigma
                         + 2 * latent_dim * hidden_dim       # decoder layer 1 (stacked K=2L)
                         + hidden_dim * input_dim)           # decoder layer 2
    transcendentals = batch * (2 * latent_dim + input_dim)   # softplus exp/log1p + tanh
    bytes_accessed = (2 * batch * input_dim                  # x (bf16)
                      + 4 * batch * input_dim                # out (f32)
                      + 4 * batch * 2 * latent_dim           # eps (f32, padded)
                      + 2 * (w1.size + wms.size + wg1s.size + wg2.size)
                      + 4 * (b1.size + bms.size + bg1.size + bg2.size))

    kernel = functools.partial(vae_forward_kernel, latent_dim=latent_dim)
    out = pl.pallas_call(
        kernel,
        out_shape=jax.ShapeDtypeStruct((padded_batch, input_dim), jnp.float32),
        grid=grid,
        in_specs=in_specs,
        out_specs=out_specs,
        compiler_params=pltpu.CompilerParams(
            dimension_semantics=("parallel",),
            vmem_limit_bytes=vmem_limit),
        cost_estimate=pl.CostEstimate(
            flops=flops,
            transcendentals=transcendentals,
            bytes_accessed=bytes_accessed),
    )(x, eps2, w1, b1, wms, bms, wg1s, bg1, wg2, bg2)

    return out[:batch] if padded_batch != batch else out


def _linear_params(key, fan_in, fan_out):
    """Deterministic nn.Linear-style init; weight returned as [in, out] (pre-transposed)."""
    kw, kb = jax.random.split(key)
    bound = 1.0 / jnp.sqrt(float(fan_in))
    w = jax.random.uniform(kw, (fan_in, fan_out), jnp.float32, -bound, bound)
    b = jax.random.uniform(kb, (1, fan_out), jnp.float32, -bound, bound)
    return w, b


if __name__ == "__main__":
    # Shapes consistent with VAE(latent_dim, input_dim, hidden_dim); 2 batch tiles.
    batch = 256
    input_dim = 128
    hidden_dim = 64
    latent_dim = 8

    root = jax.random.PRNGKey(0)
    k_x, k_eps, k1, k2, k3, k4, k5 = jax.random.split(root, 7)

    # input batch and reparameterization noise (deterministic, computed host-side)
    # TODO(synk): eps could be generated in-kernel with pltpu.prng_* to drop this stream,
    # at the cost of host-reproducibility.
    x = jax.random.uniform(k_x, (batch, input_dim), jnp.float32)
    eps = jax.random.normal(k_eps, (batch, latent_dim), jnp.float32)
    # pad eps into lanes [L:2L] so the kernel needs no cross-lane realignment.
    eps2 = jnp.concatenate([jnp.zeros_like(eps), eps], axis=1)          # (batch, 2L)

    # parameters (deterministic init, shapes taken from the module's __init__);
    # weights cast to bf16 for MXU-native matmuls, biases kept in f32.
    w1_f, b1 = _linear_params(k1, input_dim, hidden_dim)      # proposal_z Linear
    wmu_f, bmu = _linear_params(k2, hidden_dim, latent_dim)   # proposal_mu
    wsig_f, bsig = _linear_params(k3, hidden_dim, latent_dim)  # proposal_sigma
    wg1_f, bg1 = _linear_params(k4, latent_dim, hidden_dim)   # decoder layer 1
    wg2_f, bg2 = _linear_params(k5, hidden_dim, input_dim)    # decoder layer 2

    w1 = w1_f.astype(jnp.bfloat16)
    wmu = wmu_f.astype(jnp.bfloat16)
    wsig = wsig_f.astype(jnp.bfloat16)
    wg1 = wg1_f.astype(jnp.bfloat16)
    wg2 = wg2_f.astype(jnp.bfloat16)

    # fuse mu/sigma projection weights: one (hidden_dim, 2*latent_dim) matmul.
    wms = jnp.concatenate([wmu, wsig], axis=1)
    bms = jnp.concatenate([bmu, bsig], axis=1)
    # stacked decoder-1 weight: [mu | eps*sigma] @ [Wg1; Wg1] == z @ Wg1.
    wg1s = jnp.concatenate([wg1, wg1], axis=0)                          # (2L, H)

    params = (w1, b1, wms, bms, wg1s, bg1, wg2, bg2)

    out = jax.jit(vae_forward)(x, eps2, params)
    jax.block_until_ready(out)

    # Pure-JAX reference check (mirrors the kernel's exact math, outside Pallas)
    xb = x.astype(jnp.bfloat16)
    h = jnp.dot(xb, w1, preferred_element_type=jnp.float32) + b1
    h = jnp.where(h > 0, h, 0.01 * h)
    ms = jnp.dot(h.astype(jnp.bfloat16), wms, preferred_element_type=jnp.float32) + bms
    sp = jnp.maximum(ms, 0.0) + jnp.log1p(jnp.exp(-jnp.abs(ms)))
    lane = jnp.arange(2 * latent_dim)[None, :]
    v = jnp.where(lane < latent_dim, ms, eps2 * sp)
    g = jnp.dot(v.astype(jnp.bfloat16), wg1s, preferred_element_type=jnp.float32) + bg1
    g = jnp.where(g > 0, g, 0.01 * g)
    o = jnp.dot(g.astype(jnp.bfloat16), wg2, preferred_element_type=jnp.float32) + bg2
    ref = jnp.clip(0.5 * jnp.tanh(0.5 * o) + 0.5, 0.01, 0.99)

    assert out.shape == x.shape, (out.shape, x.shape)
    assert jnp.allclose(out, ref, atol=1e-4, rtol=1e-4), float(jnp.max(jnp.abs(out - ref)))

    print("KERNEL_OK")
</pallas_src>

<mosaic_0001>
module attributes {stable_mosaic.version = 11 : i64} {
  func.func @vae_forward_kernel(%arg0: i32, %arg1: memref<128x128xbf16, #tpu.memory_space<vmem>>, %arg2: memref<128x16xf32, #tpu.memory_space<vmem>>, %arg3: memref<128x64xbf16, #tpu.memory_space<vmem>>, %arg4: memref<1x64xf32, #tpu.memory_space<vmem>>, %arg5: memref<64x16xbf16, #tpu.memory_space<vmem>>, %arg6: memref<1x16xf32, #tpu.memory_space<vmem>>, %arg7: memref<16x64xbf16, #tpu.memory_space<vmem>>, %arg8: memref<1x64xf32, #tpu.memory_space<vmem>>, %arg9: memref<64x128xbf16, #tpu.memory_space<vmem>>, %arg10: memref<1x128xf32, #tpu.memory_space<vmem>>, %arg11: memref<128x128xf32, #tpu.memory_space<vmem>>) attributes {dimension_semantics = [#tpu.dimension_semantics<parallel>], iteration_bounds = array<i64: 2>, scalar_prefetch = 0 : i64, scratch_operands = 0 : i64, tpu.core_type = #tpu.core_type<tc>, window_params = [{transform_indices = @transform_0, window_bounds = array<i64: 128, 128>}, {transform_indices = @transform_1, window_bounds = array<i64: 128, 16>}, {pipeline_mode = #tpu.pipeline_mode<synchronous>, transform_indices = @transform_2, window_bounds = array<i64: 128, 64>}, {pipeline_mode = #tpu.pipeline_mode<synchronous>, transform_indices = @transform_3, window_bounds = array<i64: 1, 64>}, {pipeline_mode = #tpu.pipeline_mode<synchronous>, transform_indices = @transform_4, window_bounds = array<i64: 64, 16>}, {pipeline_mode = #tpu.pipeline_mode<synchronous>, transform_indices = @transform_5, window_bounds = array<i64: 1, 16>}, {pipeline_mode = #tpu.pipeline_mode<synchronous>, transform_indices = @transform_6, window_bounds = array<i64: 16, 64>}, {pipeline_mode = #tpu.pipeline_mode<synchronous>, transform_indices = @transform_7, window_bounds = array<i64: 1, 64>}, {pipeline_mode = #tpu.pipeline_mode<synchronous>, transform_indices = @transform_8, window_bounds = array<i64: 64, 128>}, {pipeline_mode = #tpu.pipeline_mode<synchronous>, transform_indices = @transform_9, window_bounds = array<i64: 1, 128>}, {transform_indices = @transform_10, window_bounds = array<i64: 128, 128>}]} {
    %c0 = arith.constant 0 : index
    %c0_0 = arith.constant 0 : index
    %0 = vector.load %arg1[%c0, %c0_0] : memref<128x128xbf16, #tpu.memory_space<vmem>>, vector<128x128xbf16>
    %c0_1 = arith.constant 0 : index
    %c0_2 = arith.constant 0 : index
    %1 = vector.load %arg3[%c0_1, %c0_2] : memref<128x64xbf16, #tpu.memory_space<vmem>>, vector<128x64xbf16>
    %cst = arith.constant dense<0.000000e+00> : vector<128x64xf32>
    %2 = tpu.matmul %0, %1, %cst {dimension_numbers = #tpu.dot_dimension_numbers<[1], [0], [0], [1], [0, 0, 1, 1], [], []>} : vector<128x128xbf16>, vector<128x64xbf16>, vector<128x64xf32> -> vector<128x64xf32>
    %c0_3 = arith.constant 0 : index
    %c0_4 = arith.constant 0 : index
    %3 = vector.load %arg4[%c0_3, %c0_4] : memref<1x64xf32, #tpu.memory_space<vmem>>, vector<1x64xf32>
    %4 = vector.broadcast %3 : vector<1x64xf32> to vector<128x64xf32>
    %5 = arith.addf %2, %4 : vector<128x64xf32>
    %cst_5 = arith.constant 0.000000e+00 : f32
    %6 = vector.broadcast %cst_5 : f32 to vector<128x64xf32>
    %7 = arith.cmpf ogt, %5, %6 : vector<128x64xf32>
    %cst_6 = arith.constant 0.00999999977 : f32
    %8 = vector.broadcast %cst_6 : f32 to vector<128x64xf32>
    %9 = arith.mulf %8, %5 : vector<128x64xf32>
    %10 = arith.select %7, %5, %9 : vector<128x64xi1>, vector<128x64xf32>
    %11 = arith.truncf %10 : vector<128x64xf32> to vector<128x64xbf16>
    %c0_7 = arith.constant 0 : index
    %c0_8 = arith.constant 0 : index
    %12 = vector.load %arg5[%c0_7, %c0_8] : memref<64x16xbf16, #tpu.memory_space<vmem>>, vector<64x16xbf16>
    %cst_9 = arith.constant dense<0.000000e+00> : vector<128x16xf32>
    %13 = tpu.matmul %11, %12, %cst_9 {dimension_numbers = #tpu.dot_dimension_numbers<[1], [0], [0], [1], [0, 0, 1, 1], [], []>} : vector<128x64xbf16>, vector<64x16xbf16>, vector<128x16xf32> -> vector<128x16xf32>
    %c0_10 = arith.constant 0 : index
    %c0_11 = arith.constant 0 : index
    %14 = vector.load %arg6[%c0_10, %c0_11] : memref<1x16xf32, #tpu.memory_space<vmem>>, vector<1x16xf32>
    %15 = vector.broadcast %14 : vector<1x16xf32> to vector<128x16xf32>
    %16 = arith.addf %13, %15 : vector<128x16xf32>
    %cst_12 = arith.constant 0.000000e+00 : f32
    %17 = vector.broadcast %cst_12 : f32 to vector<128x16xf32>
    %18 = arith.maximumf %16, %17 : vector<128x16xf32>
    %19 = math.absf %16 : vector<128x16xf32>
    %cst_13 = arith.constant 0.000000e+00 : f32
    %20 = vector.broadcast %cst_13 : f32 to vector<128x16xf32>
    %21 = arith.subf %20, %19 : vector<128x16xf32>
    %22 = math.exp %21 : vector<128x16xf32>
    %23 = math.log1p %22 : vector<128x16xf32>
    %24 = arith.addf %18, %23 : vector<128x16xf32>
    %25 = tpu.iota {dimensions = array<i32: 1>} : vector<128x16xi32>
    %c8_i32 = arith.constant 8 : i32
    %26 = vector.broadcast %c8_i32 : i32 to vector<128x16xi32>
    %27 = arith.cmpi slt, %25, %26 : vector<128x16xi32>
    %c0_14 = arith.constant 0 : index
    %c0_15 = arith.constant 0 : index
    %28 = vector.load %arg2[%c0_14, %c0_15] : memref<128x16xf32, #tpu.memory_space<vmem>>, vector<128x16xf32>
    %29 = arith.mulf %28, %24 : vector<128x16xf32>
    %30 = arith.select %27, %16, %29 : vector<128x16xi1>, vector<128x16xf32>
    %31 = arith.truncf %30 : vector<128x16xf32> to vector<128x16xbf16>
    %c0_16 = arith.constant 0 : index
    %c0_17 = arith.constant 0 : index
    %32 = vector.load %arg7[%c0_16, %c0_17] : memref<16x64xbf16, #tpu.memory_space<vmem>>, vector<16x64xbf16>
    %cst_18 = arith.constant dense<0.000000e+00> : vector<128x64xf32>
    %33 = tpu.matmul %31, %32, %cst_18 {dimension_numbers = #tpu.dot_dimension_numbers<[1], [0], [0], [1], [0, 0, 1, 1], [], []>} : vector<128x16xbf16>, vector<16x64xbf16>, vector<128x64xf32> -> vector<128x64xf32>
    %c0_19 = arith.constant 0 : index
    %c0_20 = arith.constant 0 : index
    %34 = vector.load %arg8[%c0_19, %c0_20] : memref<1x64xf32, #tpu.memory_space<vmem>>, vector<1x64xf32>
    %35 = vector.broadcast %34 : vector<1x64xf32> to vector<128x64xf32>
    %36 = arith.addf %33, %35 : vector<128x64xf32>
    %cst_21 = arith.constant 0.000000e+00 : f32
    %37 = vector.broadcast %cst_21 : f32 to vector<128x64xf32>
    %38 = arith.cmpf ogt, %36, %37 : vector<128x64xf32>
    %cst_22 = arith.constant 0.00999999977 : f32
    %39 = vector.broadcast %cst_22 : f32 to vector<128x64xf32>
    %40 = arith.mulf %39, %36 : vector<128x64xf32>
    %41 = arith.select %38, %36, %40 : vector<128x64xi1>, vector<128x64xf32>
    %42 = arith.truncf %41 : vector<128x64xf32> to vector<128x64xbf16>
    %c0_23 = arith.constant 0 : index
    %c0_24 = arith.constant 0 : index
    %43 = vector.load %arg9[%c0_23, %c0_24] : memref<64x128xbf16, #tpu.memory_space<vmem>>, vector<64x128xbf16>
    %cst_25 = arith.constant dense<0.000000e+00> : vector<128x128xf32>
    %44 = tpu.matmul %42, %43, %cst_25 {dimension_numbers = #tpu.dot_dimension_numbers<[1], [0], [0], [1], [0, 0, 1, 1], [], []>} : vector<128x64xbf16>, vector<64x128xbf16>, vector<128x128xf32> -> vector<128x128xf32>
    %c0_26 = arith.constant 0 : index
    %c0_27 = arith.constant 0 : index
    %45 = vector.load %arg10[%c0_26, %c0_27] : memref<1x128xf32, #tpu.memory_space<vmem>>, vector<1x128xf32>
    %46 = vector.broadcast %45 : vector<1x128xf32> to vector<128x128xf32>
    %47 = arith.addf %44, %46 : vector<128x128xf32>
    %cst_28 = arith.constant 5.000000e-01 : f32
    %48 = vector.broadcast %cst_28 : f32 to vector<128x128xf32>
    %49 = arith.mulf %48, %47 : vector<128x128xf32>
    %50 = math.tanh %49 : vector<128x128xf32>
    %cst_29 = arith.constant 5.000000e-01 : f32
    %51 = vector.broadcast %cst_29 : f32 to vector<128x128xf32>
    %52 = arith.mulf %51, %50 : vector<128x128xf32>
    %cst_30 = arith.constant 5.000000e-01 : f32
    %53 = vector.broadcast %cst_30 : f32 to vector<128x128xf32>
    %54 = arith.addf %52, %53 : vector<128x128xf32>
    %cst_31 = arith.constant 0.00999999977 : f32
    %cst_32 = arith.constant 9.900000e-01 : f32
    %55 = vector.broadcast %cst_31 : f32 to vector<128x128xf32>
    %56 = arith.maximumf %55, %54 : vector<128x128xf32>
    %57 = vector.broadcast %cst_32 : f32 to vector<128x128xf32>
    %58 = arith.minimumf %57, %56 : vector<128x128xf32>
    %c0_33 = arith.constant 0 : index
    %c0_34 = arith.constant 0 : index
    %59 = vector.load %arg11[%c0_33, %c0_34] : memref<128x128xf32, #tpu.memory_space<vmem>>, vector<128x128xf32>
    tpu.vector_store %arg11[%c0_33, %c0_34], %58 {strides = array<i32>} : memref<128x128xf32, #tpu.memory_space<vmem>>, vector<128x128xf32>,
    return
  }
  func.func @transform_0(%arg0: i32) -> (i32, i32) {
    %c0_i32 = arith.constant 0 : i32
    %c0_i32_0 = arith.constant 0 : i32
    return %arg0, %c0_i32 : i32, i32
  }
  func.func @transform_1(%arg0: i32) -> (i32, i32) {
    %c0_i32 = arith.constant 0 : i32
    %c0_i32_0 = arith.constant 0 : i32
    return %arg0, %c0_i32 : i32, i32
  }
  func.func @transform_2(%arg0: i32) -> (i32, i32) {
    %c0_i32 = arith.constant 0 : i32
    %c0_i32_0 = arith.constant 0 : i32
    %c0_i32_1 = arith.constant 0 : i32
    return %c0_i32, %c0_i32_0 : i32, i32
  }
  func.func @transform_3(%arg0: i32) -> (i32, i32) {
    %c0_i32 = arith.constant 0 : i32
    %c0_i32_0 = arith.constant 0 : i32
    %c0_i32_1 = arith.constant 0 : i32
    return %c0_i32, %c0_i32_0 : i32, i32
  }
  func.func @transform_4(%arg0: i32) -> (i32, i32) {
    %c0_i32 = arith.constant 0 : i32
    %c0_i32_0 = arith.constant 0 : i32
    %c0_i32_1 = arith.constant 0 : i32
    return %c0_i32, %c0_i32_0 : i32, i32
  }
  func.func @transform_5(%arg0: i32) -> (i32, i32) {
    %c0_i32 = arith.constant 0 : i32
    %c0_i32_0 = arith.constant 0 : i32
    %c0_i32_1 = arith.constant 0 : i32
    return %c0_i32, %c0_i32_0 : i32, i32
  }
  func.func @transform_6(%arg0: i32) -> (i32, i32) {
    %c0_i32 = arith.constant 0 : i32
    %c0_i32_0 = arith.constant 0 : i32
    %c0_i32_1 = arith.constant 0 : i32
    return %c0_i32, %c0_i32_0 : i32, i32
  }
  func.func @transform_7(%arg0: i32) -> (i32, i32) {
    %c0_i32 = arith.constant 0 : i32
    %c0_i32_0 = arith.constant 0 : i32
    %c0_i32_1 = arith.constant 0 : i32
    return %c0_i32, %c0_i32_0 : i32, i32
  }
  func.func @transform_8(%arg0: i32) -> (i32, i32) {
    %c0_i32 = arith.constant 0 : i32
    %c0_i32_0 = arith.constant 0 : i32
    %c0_i32_1 = arith.constant 0 : i32
    return %c0_i32, %c0_i32_0 : i32, i32
  }
  func.func @transform_9(%arg0: i32) -> (i32, i32) {
    %c0_i32 = arith.constant 0 : i32
    %c0_i32_0 = arith.constant 0 : i32
    %c0_i32_1 = arith.constant 0 : i32
    return %c0_i32, %c0_i32_0 : i32, i32
  }
  func.func @transform_10(%arg0: i32) -> (i32, i32) {
    %c0_i32 = arith.constant 0 : i32
    %c0_i32_0 = arith.constant 0 : i32
    return %arg0, %c0_i32 : i32, i32
  }
}

</mosaic_0001>

<bundles_post_ra>
// kernel: vae_forward.1
= control target key start
LH: loop header
LB: loop body
LE: loop exit
PB: predicated region body
PF: predicated region fallthrough
CT: control target
= control target key end

     0   :  { %15 = vsyncpa [#allocation3], 0  ;;  %s2315_s0 = inlined_call_operand.vmem [shape: bf16[256,128], index: 0, kind: input, shape index: {}]   ;;  %s2316_s1 = inlined_call_operand.vmem [shape: f32[256,16], index: 1, kind: input, shape index: {}]   ;;  %s2317_s2 = inlined_call_operand.vmem [shape: bf16[128,64], index: 2, kind: input, shape index: {}]   ;;  %s2318_s3 = inlined_call_operand.vmem [shape: f32[1,64], index: 3, kind: input, shape index: {}]   ;;  %s2319_s4 = inlined_call_operand.vmem [shape: bf16[64,16], index: 4, kind: input, shape index: {}]   ;;  %s2320_s5 = inlined_call_operand.vmem [shape: f32[1,16], index: 5, kind: input, shape index: {}]   ;;  %s2321_s6 = inlined_call_operand.vmem [shape: bf16[16,64], index: 6, kind: input, shape index: {}]   ;;  %s2322_s7 = inlined_call_operand.vmem [shape: f32[1,64], index: 7, kind: input, shape index: {}]   ;;  %s2323_s8 = inlined_call_operand.vmem [shape: bf16[64,128], index: 8, kind: input, shape index: {}]   ;;  %s2324_s9 = inlined_call_operand.vmem [shape: f32[1,128], index: 9, kind: input, shape index: {}]   ;;  %s2325_s10 = inlined_call_operand.hbm [shape: f32[256,128], index: 10, kind: output, shape index: {}]  }
   0x1   :  { %17 = vsyncpa [#allocation3 + $0x1], 0  ;;  %s1909_s13 = smov 0   ;;  %s1911_s14 = smov 0  }
   0x2   :  { %s1913_s15 = smov 0   ;;  %s1915_s16 = smov 0  }
   0x3 LB: > { %s1930_s17 = sadd.s32 4294967295, %s1850_s16   ;;  %s1483_s18 = sadd.s32 4294967294, %s1850_s16   ;;  %s1850_s16 = sphi %s1915_s16, %s2331_s16   ;;  %s1846_s15 = sphi %s1913_s15, %s2330_s15   ;;  %s1842_s14 = sphi %s1911_s14, %s2329_s14   ;;  %s1838_s13 = sphi %s1909_s13, %s2328_s13  }
   0x4   : > { %s1934_s19 = sadd.s32 1, %s1850_s16   ;;  %s250_s20 = sadd.s32 1, %s1846_s15 }
   0x5   : > { %s247_s21 = ssub.s32 %s1850_s16, %s1934_s19  ;;  %p260_p0 = scmp.ne.s32.totalorder %s1846_s15, %s1842_s14 }
   0x6   : > { %p248_p1 = scmp.eq.s32.totalorder %s247_s21, 0  ;;  %p261_p2 = scmp.eq.s32.totalorder %s1930_s17, 1 }
   0x7   : > { %p266_p3 = scmp.ne.s32.totalorder %s1842_s14, %s1838_s13  ;;  %p267_p4 = scmp.eq.s32.totalorder %s1483_s18, 1 }
   0x8   : > { %s1945_s22 = scalar_select %p248_p1, %s1846_s15, %s250_s20  }
   0x9   : > { %p1947_p5 = por %p261_p2, %p260_p0  ;;  %p1951_p6 = por %p267_p4, %p266_p3 }
   0xa   : > { %p1486_p7 = scmp.ge.s32.totalorder %s1850_s16, 1  ;;  %p327_p8 = scmp.lt.s32.totalorder %s1850_s16, 3 }
   0xc   : > { %p328_p9 = pnand %p1486_p7, %p327_p8 }
   0xd   : > { %s1488_s18 = sshll.u32 (!%p328_p9), %s1930_s17, 4  ;;  %s367_s20 = sand.u32 (!%p328_p9), 1, %s1842_s14  }
   0xe   : > { %331 = sbr.rel (%p328_p9) target bundleno = 782 (0x30e), region = 60  ;;  %p371_p10 = scmp.lt.s32.totalorder (!%p328_p9), %s1488_s18, 31 }
   0xf   : > { %s1487_s25 = sshll.u32 (!%p328_p9), %s367_s20, 7  ;;  %s1646_s26 = sshll.u32 (!%p328_p9), %s1930_s17, 7 }
  0x10   : > { %s1808_s27 = scalar_lea.hbm (!%p328_p9), %s2325_s10, 256 }
  0x13   : > { %v1636_v0 = vld [vmem:[%s2317_s2 + $0x38] sm:$0xff]  ;;  %v1635_v1 = vld [vmem:[%s2317_s2 + $0x30] sm:$0xff]  ;;  %v1634_v2 = vld [vmem:[%s2317_s2 + $0x28] sm:$0xff]  ;;  %s2333_s18 = smov (!%p371_p10, %s1488_s18), 31  ;;  %vm657_vm2 = vcmask 523264  }
  0x14   : > { %516 = vmatpush.bf16.msra.mxu0 %v1636_v0  ;;  %v1633_v3 = vld [vmem:[%s2317_s2 + $0x20] sm:$0xff]  ;;  %v1632_v4 = vld [vmem:[%s2317_s2 + $0x18] sm:$0xff]  ;;  %v1631_v5 = vld [vmem:[%s2317_s2 + $0x10] sm:$0xff]  ;;  %s1489_s29 = sshll.u32 %s2333_s18, 2 }
  0x15   : > { %v1630_v6 = vld [vmem:[%s2317_s2 + $0x8] sm:$0xff]  ;;  %v1629_v7 = vld [vmem:[%s2317_s2] sm:$0xff]  ;;  %s374_s21 = scalar_lea.vmem %s2315_s0, %s1489_s29  ;;  %v1640_v15 = vld [vmem:[%s2319_s4 + $0x18] sm:$0xff]  ;;  %s1491_s29 = sshll.u32 %s2333_s18, 3 }
  0x16   : > { %v1621_v8 = vld [vmem:[%s374_s21] sm:$0xff]  ;;  %v1622_v9 = vld [vmem:[%s374_s21 + $0x8] sm:$0xff]  ;;  %v1623_v10 = vld [vmem:[%s374_s21 + $0x10] sm:$0xff]  ;;  %686 = vmatpush.bf16.msra.mxu1 %v1640_v15  ;;  %s2057_s12 = scalar_lea.vmem %s2316_s1, %s1491_s29  ;;  %s1405_s29 = scalar_lea.hbm %s2325_s10, %s1646_s26 }
  0x17   : > { %v1624_v11 = vld [vmem:[%s374_s21 + $0x18] sm:$0xff]  ;;  %v1625_v12 = vld [vmem:[%s374_s21 + $0x20] sm:$0xff]  ;;  %v1626_v13 = vld [vmem:[%s374_s21 + $0x28] sm:$0xff]  ;;  %s1408_s11 = sshll.u32 %s1405_s29, 4  ;;  %s1409_s11 = int_to_ptr.hbm [resolvable:$true] %s1408_s11 }
  0x18   : > { %517 = vmatpush.bf16.msra.mxu0 %v1635_v1  ;;  %v1627_v14 = vld [vmem:[%s374_s21 + $0x30] sm:$0xff]  ;;  %v1638_v17 = vld [vmem:[%s2319_s4 + $0x8] sm:$0xff]  ;;  %v1637_v18 = vld [vmem:[%s2319_s4] sm:$0xff]  ;;  %s1802_s17 = sshra.s32 %s1409_s11, 4  ;;  %s1803_s17 = int_to_ptr.hbm [resolvable:$true] %s1802_s17 }
  0x19   : > { %v1639_v16 = vld [vmem:[%s2319_s4 + $0x10] sm:$0xff]  ;;  %v1628_v19 = vld [vmem:[%s374_s21 + $0x38] sm:$0xff]  ;;  %v2003_v21 = vld [vmem:[%s2318_s3] ss:$0 sm:$0xff]  ;;  %s2250_s21 = scalar_lea.vmem [#allocation2], %s1487_s25  ;;  %s1804_s18 = scalar_lea.hbm %s1803_s17, 128 }
  0x1a   : > { %687 = vmatpush.bf16.msra.mxu1 %v1639_v16  ;;  %s1406_s30 = sshll.u32 %s2250_s21, 4  ;;  %p1805_p11 = scmp.ne.s32.totalorder %s1803_s17, %s1804_s18  ;;  %s1407_s30 = int_to_ptr.vmem [resolvable:$true] %s1406_s30 }
  0x1b   : > { %p1809_p0 = scmp.lt.s32.totalorder %s1803_s17, %s2325_s10  ;;  %p1810_p1 = scmp.lt.s32.totalorder %s1808_s27, %s1804_s18 }
  0x1c   : > { %518 = vmatpush.bf16.msra.mxu0 %v1634_v2  ;;  %p1806_p12 = pnand %p1805_p11, %p1947_p5 }
  0x1d   : > { %p1811_p2 = por %p1810_p1, %p1809_p0 }
  0x1e   : > { %688 = vmatpush.bf16.msra.mxu1 %v1638_v17  ;;  %p1807_p13 = pneg %p1806_p12 }
  0x20   : > { %519 = vmatpush.bf16.msra.mxu0 %v1633_v3  ;;  %p1812_p3 = pnand %p1811_p2, %p1807_p13 }
  0x22   : > { %689 = vmatpush.bf16.msra.mxu1 %v1637_v18 }
  0x24   : > { %520 = vmatpush.bf16.msra.mxu0 %v1632_v4 }
  0x28   : > { %521 = vmatpush.bf16.msra.mxu0 %v1631_v5 }
  0x2c   : > { %522 = vmatpush.bf16.msra.mxu0 %v1630_v6 }
  0x30   : > { %523 = vmatpush.bf16.msra.mxu0 %v1629_v7 }
  0x33   : > { %524 = vmatmul.bf16.vlgmr.msra.gmra.mxu0 %v1621_v8 }
  0x43   : > { %529 = vmatmul.bf16.gmra.mxu0 %v1622_v9 }
  0x53   : > { %534 = vmatmul.bf16.gmra.mxu0 %v1623_v10 }
  0x63   : > { %539 = vmatmul.bf16.gmra.mxu0 %v1624_v11 }
  0x73   : > { %544 = vmatmul.bf16.gmra.mxu0 %v1625_v12 }
  0x83   : > { %549 = vmatmul.bf16.gmra.mxu0 %v1626_v13 }
  0x93   : > { %554 = vmatmul.bf16.gmra.mxu0 %v1627_v14 }
  0xa3   : > { %559 = vmatmul.bf16.gmra.mxu0 %v1628_v19 }
  0xb0   : > { %v525_v20 = vpop.f32.mrf.mxu0 }
  0xb1   : > { %v526_v22 = vadd.f32 %v2003_v21, %v525_v20 }
  0xb3   : > { %v581_v24 = vmul.f32 0.01, %v526_v22  ;;  %vm565_vm0 = vcmp.gt.f32.partialorder %v526_v22, 0.0 }
  0xb5   : > { %v597_v27 = vsel %vm565_vm0, %v526_v22, %v581_v24 }
  0xb8   : > { %v527_v23 = vpop.f32.mrf.mxu0 }
  0xb9   : > { %v528_v25 = vadd.f32 %v2003_v21, %v527_v23 }
  0xbb   : > { %vm566_vm1 = vcmp.gt.f32.partialorder %v528_v25, 0.0  ;;  %v582_v26 = vmul.f32 0.01, %v528_v25 }
  0xbd   : > { %v598_v28 = vsel %vm566_vm1, %v528_v25, %v582_v26 }
  0xbe   : > { %v613_v29 = vpack.c.bf16 %v598_v28, %v597_v27 }
  0xc0   : > { %v530_v30 = vpop.f32.mrf.mxu0  ;;  %1572 = vmatmul.msk.bf16.vlgmr.msra.gmra.mxu1 %vm657_vm2, %v613_v29 }
  0xc1   : > { %v531_v31 = vadd.f32 %v2003_v21, %v530_v30  ;;  %v2032_v30 = vld [vmem:[%s2320_s5] ss:$0 sm:$0xff] }
  0xc3   : > { %v583_v33 = vmul.f32 0.01, %v531_v31  ;;  %vm567_vm3 = vcmp.gt.f32.partialorder %v531_v31, 0.0 }
  0xc5   : > { %v599_v36 = vsel %vm567_vm3, %v531_v31, %v583_v33 }
  0xc8   : > { %v532_v32 = vpop.f32.mrf.mxu0 }
  0xc9   : > { %v533_v34 = vadd.f32 %v2003_v21, %v532_v32 }
  0xcb   : > { %vm568_vm4 = vcmp.gt.f32.partialorder %v533_v34, 0.0  ;;  %v584_v35 = vmul.f32 0.01, %v533_v34 }
  0xcd   : > { %v600_v37 = vsel %vm568_vm4, %v533_v34, %v584_v35  ;;  %v1641_v34 = vld [vmem:[%s2321_s6] sm:$0xff] }
  0xce   : > { %v614_v38 = vpack.c.bf16 %v600_v37, %v599_v36  ;;  %1074 = vmatpush.bf16.msra.mxu2 %v1641_v34 }
  0xd0   : > { %v535_v39 = vpop.f32.mrf.mxu0  ;;  %1573 = vmatmul.msk.bf16.gmra.mxu1 %vm657_vm2, %v614_v38 }
  0xd1   : > { %v536_v40 = vadd.f32 %v2003_v21, %v535_v39 }
  0xd3   : > { %v585_v42 = vmul.f32 0.01, %v536_v40  ;;  %vm569_vm5 = vcmp.gt.f32.partialorder %v536_v40, 0.0 }
  0xd5   : > { %v601_v45 = vsel %vm569_vm5, %v536_v40, %v585_v42  ;;  %vm1042_vm5 = vcmask 130048  }
  0xd8   : > { %v537_v41 = vpop.f32.mrf.mxu0 }
  0xd9   : > { %v538_v43 = vadd.f32 %v2003_v21, %v537_v41 }
  0xdb   : > { %vm570_vm6 = vcmp.gt.f32.partialorder %v538_v43, 0.0  ;;  %v586_v44 = vmul.f32 0.01, %v538_v43 }
  0xdd   : > { %v602_v46 = vsel %vm570_vm6, %v538_v43, %v586_v44 }
  0xde   : > { %v615_v47 = vpack.c.bf16 %v602_v46, %v601_v45 }
  0xe0   : > { %v540_v48 = vpop.f32.mrf.mxu0  ;;  %1574 = vmatmul.msk.bf16.gmra.mxu1 %vm657_vm2, %v615_v47 }
  0xe1   : > { %v541_v49 = vadd.f32 %v2003_v21, %v540_v48 }
  0xe3   : > { %v587_v51 = vmul.f32 0.01, %v541_v49  ;;  %vm571_vm7 = vcmp.gt.f32.partialorder %v541_v49, 0.0 }
  0xe5   : > { %v603_v54 = vsel %vm571_vm7, %v541_v49, %v587_v51 }
  0xe8   : > { %v542_v50 = vpop.f32.mrf.mxu0 }
  0xe9   : > { %v543_v52 = vadd.f32 %v2003_v21, %v542_v50 }
  0xeb   : > { %vm572_vm8 = vcmp.gt.f32.partialorder %v543_v52, 0.0  ;;  %v588_v53 = vmul.f32 0.01, %v543_v52 }
  0xed   : > { %v604_v55 = vsel %vm572_vm8, %v543_v52, %v588_v53 }
  0xee   : > { %v616_v56 = vpack.c.bf16 %v604_v55, %v603_v54 }
  0xf0   : > { %v545_v57 = vpop.f32.mrf.mxu0  ;;  %1575 = vmatmul.msk.bf16.gmra.mxu1 %vm657_vm2, %v616_v56 }
  0xf1   : > { %v546_v58 = vadd.f32 %v2003_v21, %v545_v57 }
  0xf3   : > { %v589_v60 = vmul.f32 0.01, %v546_v58  ;;  %vm573_vm9 = vcmp.gt.f32.partialorder %v546_v58, 0.0 }
  0xf5   : > { %v605_v63 = vsel %vm573_vm9, %v546_v58, %v589_v60  ;;  %v971_v60 = vlaneseq }
  0xf8   : > { %v547_v59 = vpop.f32.mrf.mxu0 }
  0xf9   : > { %v548_v61 = vadd.f32 %v2003_v21, %v547_v59 }
  0xfb   : > { %vm574_vm10 = vcmp.gt.f32.partialorder %v548_v61, 0.0  ;;  %v590_v62 = vmul.f32 0.01, %v548_v61 }
  0xfd   : > { %v606_v0 = vsel %vm574_vm10, %v548_v61, %v590_v62 }
  0xfe   : > { %v617_v1 = vpack.c.bf16 %v606_v0, %v605_v63 }
 0x100   : > { %v550_v2 = vpop.f32.mrf.mxu0  ;;  %1576 = vmatmul.msk.bf16.gmra.mxu1 %vm657_vm2, %v617_v1 }
 0x101   : > { %v551_v3 = vadd.f32 %v2003_v21, %v550_v2 }
 0x103   : > { %v591_v5 = vmul.f32 0.01, %v551_v3  ;;  %vm575_vm11 = vcmp.gt.f32.partialorder %v551_v3, 0.0 }
 0x105   : > { %v607_v8 = vsel %vm575_vm11, %v551_v3, %v591_v5 }
 0x108   : > { %v552_v4 = vpop.f32.mrf.mxu0 }
 0x109   : > { %v553_v6 = vadd.f32 %v2003_v21, %v552_v4 }
 0x10b   : > { %vm576_vm12 = vcmp.gt.f32.partialorder %v553_v6, 0.0  ;;  %v592_v7 = vmul.f32 0.01, %v553_v6 }
 0x10d   : > { %v608_v9 = vsel %vm576_vm12, %v553_v6, %v592_v7 }
 0x10e   : > { %v618_v10 = vpack.c.bf16 %v608_v9, %v607_v8  ;;  %v2060_v8 = vand.u32 127, %v971_v60  ;;  %v974_v9 = vld [vmem:[%s2057_s12] sm:$0xff] }
 0x110   : > { %v555_v11 = vpop.f32.mrf.mxu0  ;;  %1577 = vmatmul.msk.bf16.gmra.mxu1 %vm657_vm2, %v618_v10  ;;  %vm973_vm4 = vcmp.lt.s32.totalorder %v2060_v8, 8 }
 0x111   : > { %v556_v12 = vadd.f32 %v2003_v21, %v555_v11 }
 0x113   : > { %v593_v14 = vmul.f32 0.01, %v556_v12  ;;  %vm577_vm13 = vcmp.gt.f32.partialorder %v556_v12, 0.0 }
 0x115   : > { %v609_v17 = vsel %vm577_vm13, %v556_v12, %v593_v14 }
 0x118   : > { %v557_v13 = vpop.f32.mrf.mxu0 }
 0x119   : > { %v558_v15 = vadd.f32 %v2003_v21, %v557_v13 }
 0x11b   : > { %vm578_vm14 = vcmp.gt.f32.partialorder %v558_v15, 0.0  ;;  %v594_v16 = vmul.f32 0.01, %v558_v15 }
 0x11d   : > { %v610_v18 = vsel %vm578_vm14, %v558_v15, %v594_v16  ;;  %v975_v15 = vld [vmem:[%s2057_s12 + $0x8] sm:$0xff] }
 0x11e   : > { %v619_v19 = vpack.c.bf16 %v610_v18, %v609_v17 }
 0x120   : > { %v560_v20 = vpop.f32.mrf.mxu0  ;;  %1578 = vmatmul.msk.bf16.gmra.mxu1 %vm657_vm2, %v619_v19 }
 0x121   : > { %v561_v22 = vadd.f32 %v2003_v21, %v560_v20 }
 0x123   : > { %v595_v24 = vmul.f32 0.01, %v561_v22  ;;  %vm579_vm15 = vcmp.gt.f32.partialorder %v561_v22, 0.0 }
 0x125   : > { %v611_v27 = vsel %vm579_vm15, %v561_v22, %v595_v24 }
 0x128   : > { %v562_v23 = vpop.f32.mrf.mxu0 }
 0x129   : > { %v563_v25 = vadd.f32 %v2003_v21, %v562_v23 }
 0x12b   : > { %vm580_vm0 = vcmp.gt.f32.partialorder %v563_v25, 0.0  ;;  %v596_v26 = vmul.f32 0.01, %v563_v25 }
 0x12d   : > { %v612_v28 = vsel %vm580_vm0, %v563_v25, %v596_v26 }
 0x12e   : > { %v620_v29 = vpack.c.bf16 %v612_v28, %v611_v27 }
 0x130   : > { %1579 = vmatmul.msk.bf16.gmra.mxu1 %vm657_vm2, %v620_v29 }
 0x13d   : > { %v691_v31 = vpop.f32.mrf.mxu1 }
 0x13e   : > { %v2035_v32 = vadd.f32 %v2032_v30, %v691_v31 }
 0x140   : > { %v747_v33 = vand.u32 2147483647, %v2035_v32  ;;  %v731_v0 = vmax.f32 %v2035_v32, 0.0 }
 0x142   : > { %v763_v21 = vsub.f32 0.0, %v747_v33 }
 0x144   : > { %v779_v35 = vmul.f32 1.442695, %v763_v21 }
 0x145   : > { %v693_v36 = vpop.f32.mrf.mxu1 }
 0x146   : > { %1692 = vpow2.f32 %v779_v35  ;;  %v2042_v37 = vadd.f32 %v2032_v30, %v693_v36 }
 0x148   : > { %v748_v38 = vand.u32 2147483647, %v2042_v37  ;;  %v732_v13 = vmax.f32 %v2042_v37, 0.0 }
 0x14a   : > { %v764_v39 = vsub.f32 0.0, %v748_v38 }
 0x14c   : > { %v1693_v40 = vpop.eup %1692  ;;  %v781_v41 = vmul.f32 1.442695, %v764_v39 }
 0x14d   : > { %v811_v42 = vadd.f32 1.0, %v1693_v40  ;;  %v696_v43 = vpop.f32.mrf.mxu1  ;;  %v814_v45 = vmul.f32 -0.5, %v1693_v40  ;;  %v817_v52 = vand.u32 2147483647, %v1693_v40 }
 0x14e   : > { %1694 = vpow2.f32 %v781_v41  ;;  %v2046_v44 = vadd.f32 %v2032_v30, %v696_v43 }
 0x14f   : > { %1696 = vlog2.f32 %v811_v42  ;;  %v815_v49 = vadd.f32 1.0, %v814_v45  ;;  %vm818_vm1 = vcmp.lt.f32.partialorder %v817_v52, 0.0004427343 }
 0x150   : > { %v749_v46 = vand.u32 2147483647, %v2046_v44  ;;  %v733_v42 = vmax.f32 %v2046_v44, 0.0 }
 0x151   : > { %v816_v58 = vmul.f32 %v1693_v40, %v815_v49 }
 0x152   : > { %v765_v47 = vsub.f32 0.0, %v749_v46 }
 0x154   : > { %v1695_v48 = vpop.eup %1694  ;;  %v783_v50 = vmul.f32 1.442695, %v765_v47 }
 0x155   : > { %v1697_v51 = vpop.eup %1696  ;;  %v820_v53 = vadd.f32 1.0, %v1695_v48  ;;  %v698_v54 = vpop.f32.mrf.mxu1  ;;  %v823_v56 = vmul.f32 -0.5, %v1695_v48  ;;  %v826_v1 = vand.u32 2147483647, %v1695_v48 }
 0x156   : > { %v813_v55 = vmul.f32 0.6931472, %v1697_v51  ;;  %1698 = vpow2.f32 %v783_v50  ;;  %v2050_v57 = vadd.f32 %v2032_v30, %v698_v54  ;;  %v976_v50 = vld [vmem:[%s2057_s12 + $0x10] sm:$0xff] }
 0x157   : > { %1700 = vlog2.f32 %v820_v53  ;;  %v824_v62 = vadd.f32 1.0, %v823_v56  ;;  %vm827_vm3 = vcmp.lt.f32.partialorder %v826_v1, 0.0004427343  ;;  %v977_v56 = vld [vmem:[%s2057_s12 + $0x18] sm:$0xff] }
 0x158   : > { %v750_v59 = vand.u32 2147483647, %v2050_v57  ;;  %v819_v61 = vsel %vm818_vm1, %v816_v58, %v813_v55  ;;  %v734_v54 = vmax.f32 %v2050_v57, 0.0 }
 0x159   : > { %v955_v5 = vadd.f32 %v819_v61, %v731_v0  ;;  %v825_v11 = vmul.f32 %v1695_v48, %v824_v62 }
 0x15a   : > { %v766_v63 = vsub.f32 0.0, %v750_v59 }
 0x15b   : > { %v990_v18 = vmul.f32 %v974_v9, %v955_v5 }
 0x15c   : > { %v1699_v2 = vpop.eup %1698  ;;  %v785_v3 = vmul.f32 1.442695, %v766_v63 }
 0x15d   : > { %v1701_v4 = vpop.eup %1700  ;;  %v829_v6 = vadd.f32 1.0, %v1699_v2  ;;  %v701_v7 = vpop.f32.mrf.mxu1  ;;  %v832_v16 = vmul.f32 -0.5, %v1699_v2  ;;  %v835_v25 = vand.u32 2147483647, %v1699_v2  ;;  %v1006_v33 = vsel %vm973_vm4, %v2035_v32, %v990_v18 }
 0x15e   : > { %v822_v10 = vmul.f32 0.6931472, %v1701_v4  ;;  %1702 = vpow2.f32 %v785_v3  ;;  %v2064_v12 = vadd.f32 %v2032_v30, %v701_v7 }
 0x15f   : > { %1704 = vlog2.f32 %v829_v6  ;;  %v833_v24 = vadd.f32 1.0, %v832_v16  ;;  %vm836_vm6 = vcmp.lt.f32.partialorder %v835_v25, 0.0004427343 }
 0x160   : > { %v828_v14 = vsel %vm827_vm3, %v825_v11, %v822_v10  ;;  %v751_v17 = vand.u32 2147483647, %v2064_v12 }
 0x161   : > { %v956_v19 = vadd.f32 %v828_v14, %v732_v13  ;;  %v834_v38 = vmul.f32 %v1699_v2, %v833_v24 }
 0x162   : > { %v767_v20 = vsub.f32 0.0, %v751_v17 }
 0x163   : > { %v991_v22 = vmul.f32 %v975_v15, %v956_v19  ;;  %v735_v19 = vmax.f32 %v2064_v12, 0.0 }
 0x164   : > { %v1703_v23 = vpop.eup %1702  ;;  %v787_v26 = vmul.f32 1.442695, %v767_v20 }
 0x165   : > { %v1705_v27 = vpop.eup %1704  ;;  %v838_v28 = vadd.f32 1.0, %v1703_v23  ;;  %v841_v29 = vmul.f32 -0.5, %v1703_v23  ;;  %v703_v31 = vpop.f32.mrf.mxu1  ;;  %v1007_v21 = vsel %vm973_vm4, %v2042_v37, %v991_v22  ;;  %v844_v37 = vand.u32 2147483647, %v1703_v23 }
 0x166   : > { %v831_v34 = vmul.f32 0.6931472, %v1705_v27  ;;  %1706 = vpow2.f32 %v787_v26  ;;  %v2077_v35 = vadd.f32 %v2032_v30, %v703_v31  ;;  %v1022_v36 = vpack.c.bf16 %v1007_v21, %v1006_v33  ;;  %v978_v27 = vld [vmem:[%s2057_s12 + $0x20] sm:$0xff] }
 0x167   : > { %1708 = vlog2.f32 %v838_v28  ;;  %v842_v32 = vadd.f32 1.0, %v841_v29  ;;  %vm845_vm7 = vcmp.lt.f32.partialorder %v844_v37, 0.0004427343 }
 0x168   : > { %v752_v39 = vand.u32 2147483647, %v2077_v35  ;;  %1584 = vmatmul.msk.bf16.vlgmr.msra.gmra.mxu2 %vm1042_vm5, %v1022_v36  ;;  %v837_v40 = vsel %vm836_vm6, %v834_v38, %v831_v34  ;;  %v736_v33 = vmax.f32 %v2077_v35, 0.0  ;;  %v979_v34 = vld [vmem:[%s2057_s12 + $0x28] sm:$0xff] }
 0x169   : > { %v957_v47 = vadd.f32 %v837_v40, %v733_v42  ;;  %v843_v52 = vmul.f32 %v1703_v23, %v842_v32 }
 0x16a   : > { %v768_v41 = vsub.f32 0.0, %v752_v39 }
 0x16b   : > { %v992_v60 = vmul.f32 %v976_v50, %v957_v47 }
 0x16c   : > { %v1707_v43 = vpop.eup %1706  ;;  %v789_v45 = vmul.f32 1.442695, %v768_v41 }
 0x16d   : > { %v1709_v46 = vpop.eup %1708  ;;  %v847_v48 = vadd.f32 1.0, %v1707_v43  ;;  %v706_v49 = vpop.f32.mrf.mxu1  ;;  %v850_v58 = vmul.f32 -0.5, %v1707_v43  ;;  %v853_v2 = vand.u32 2147483647, %v1707_v43  ;;  %v1008_v9 = vsel %vm973_vm4, %v2046_v44, %v992_v60 }
 0x16e   : > { %v840_v51 = vmul.f32 0.6931472, %v1709_v46  ;;  %1710 = vpow2.f32 %v789_v45  ;;  %v2084_v53 = vadd.f32 %v2032_v30, %v706_v49 }
 0x16f   : > { %1712 = vlog2.f32 %v847_v48  ;;  %v851_v1 = vadd.f32 1.0, %v850_v58  ;;  %vm854_vm8 = vcmp.lt.f32.partialorder %v853_v2, 0.0004427343 }
 0x170   : > { %v846_v55 = vsel %vm845_vm7, %v843_v52, %v840_v51  ;;  %v753_v59 = vand.u32 2147483647, %v2084_v53 }
 0x171   : > { %v958_v61 = vadd.f32 %v846_v55, %v734_v54  ;;  %v852_v15 = vmul.f32 %v1707_v43, %v851_v1 }
 0x172   : > { %v769_v62 = vsub.f32 0.0, %v753_v59 }
 0x173   : > { %v993_v63 = vmul.f32 %v977_v56, %v958_v61  ;;  %v737_v61 = vmax.f32 %v2084_v53, 0.0 }
 0x174   : > { %v1711_v0 = vpop.eup %1710  ;;  %v791_v3 = vmul.f32 1.442695, %v769_v62 }
 0x175   : > { %v1713_v4 = vpop.eup %1712  ;;  %v856_v5 = vadd.f32 1.0, %v1711_v0  ;;  %v859_v6 = vmul.f32 -0.5, %v1711_v0  ;;  %v708_v7 = vpop.f32.mrf.mxu1  ;;  %v1009_v10 = vsel %vm973_vm4, %v2050_v57, %v993_v63  ;;  %v862_v57 = vand.u32 2147483647, %v1711_v0 }
 0x176   : > { %v849_v11 = vmul.f32 0.6931472, %v1713_v4  ;;  %1714 = vpow2.f32 %v791_v3  ;;  %v2096_v13 = vadd.f32 %v2032_v30, %v708_v7  ;;  %v1023_v14 = vpack.c.bf16 %v1009_v10, %v1008_v9  ;;  %v980_v4 = vld [vmem:[%s2057_s12 + $0x30] sm:$0xff] }
 0x177   : > { %1716 = vlog2.f32 %v856_v5  ;;  %v860_v44 = vadd.f32 1.0, %v859_v6  ;;  %vm863_vm9 = vcmp.lt.f32.partialorder %v862_v57, 0.0004427343 }
 0x178   : > { %v754_v16 = vand.u32 2147483647, %v2096_v13  ;;  %1585 = vmatmul.msk.bf16.gmra.mxu2 %vm1042_vm5, %v1023_v14  ;;  %v855_v17 = vsel %vm854_vm8, %v852_v15, %v849_v11  ;;  %v738_v9 = vmax.f32 %v2096_v13, 0.0  ;;  %v981_v11 = vld [vmem:[%s2057_s12 + $0x38] sm:$0xff] }
 0x179   : > { %v959_v24 = vadd.f32 %v855_v17, %v735_v19  ;;  %v861_v29 = vmul.f32 %v1711_v0, %v860_v44 }
 0x17a   : > { %v770_v18 = vsub.f32 0.0, %v754_v16 }
 0x17b   : > { %v994_v39 = vmul.f32 %v978_v27, %v959_v24 }
 0x17c   : > { %v1715_v20 = vpop.eup %1714  ;;  %v793_v22 = vmul.f32 1.442695, %v770_v18 }
 0x17d   : > { %v1717_v23 = vpop.eup %1716  ;;  %v865_v25 = vadd.f32 1.0, %v1715_v20  ;;  %v711_v26 = vpop.f32.mrf.mxu1  ;;  %v868_v36 = vmul.f32 -0.5, %v1715_v20  ;;  %v871_v43 = vand.u32 2147483647, %v1715_v20  ;;  %v1010_v50 = vsel %vm973_vm4, %v2064_v12, %v994_v39 }
 0x17e   : > { %v858_v28 = vmul.f32 0.6931472, %v1717_v23  ;;  %1718 = vpow2.f32 %v793_v22  ;;  %v2103_v31 = vadd.f32 %v2032_v30, %v711_v26 }
 0x17f   : > { %1720 = vlog2.f32 %v865_v25  ;;  %v869_v37 = vadd.f32 1.0, %v868_v36  ;;  %vm872_vm10 = vcmp.lt.f32.partialorder %v871_v43, 0.0004427343 }
 0x180   : > { %v864_v21 = vsel %vm863_vm9, %v861_v29, %v858_v28  ;;  %v755_v38 = vand.u32 2147483647, %v2103_v31 }
 0x181   : > { %v960_v40 = vadd.f32 %v864_v21, %v736_v33  ;;  %v870_v56 = vmul.f32 %v1715_v20, %v869_v37 }
 0x182   : > { %v771_v32 = vsub.f32 0.0, %v755_v38 }
 0x183   : > { %v995_v41 = vmul.f32 %v979_v34, %v960_v40  ;;  %v739_v40 = vmax.f32 %v2103_v31, 0.0 }
 0x184   : > { %v1719_v42 = vpop.eup %1718  ;;  %v795_v45 = vmul.f32 1.442695, %v771_v32 }
 0x185   : > { %v1721_v46 = vpop.eup %1720  ;;  %v874_v47 = vadd.f32 1.0, %v1719_v42  ;;  %v877_v48 = vmul.f32 -0.5, %v1719_v42  ;;  %v713_v49 = vpop.f32.mrf.mxu1  ;;  %v1011_v51 = vsel %vm973_vm4, %v2077_v35, %v995_v41  ;;  %v880_v35 = vand.u32 2147483647, %v1719_v42 }
 0x186   : > { %v867_v52 = vmul.f32 0.6931472, %v1721_v46  ;;  %1722 = vpow2.f32 %v795_v45  ;;  %v2115_v54 = vadd.f32 %v2032_v30, %v713_v49  ;;  %v1024_v55 = vpack.c.bf16 %v1011_v51, %v1010_v50  ;;  %v982_v46 = vld [vmem:[%s2057_s12 + $0x40] sm:$0xff] }
 0x187   : > { %1724 = vlog2.f32 %v874_v47  ;;  %v878_v12 = vadd.f32 1.0, %v877_v48  ;;  %vm881_vm11 = vcmp.lt.f32.partialorder %v880_v35, 0.0004427343 }
 0x188   : > { %v756_v58 = vand.u32 2147483647, %v2115_v54  ;;  %1586 = vmatmul.msk.bf16.gmra.mxu2 %vm1042_vm5, %v1024_v55  ;;  %v873_v59 = vsel %vm872_vm10, %v870_v56, %v867_v52  ;;  %v740_v50 = vmax.f32 %v2115_v54, 0.0  ;;  %v983_v52 = vld [vmem:[%s2057_s12 + $0x48] sm:$0xff] }
 0x189   : > { %v961_v1 = vadd.f32 %v873_v59, %v737_v61  ;;  %v879_v6 = vmul.f32 %v1719_v42, %v878_v12 }
 0x18a   : > { %v772_v60 = vsub.f32 0.0, %v756_v58 }
 0x18b   : > { %v996_v16 = vmul.f32 %v980_v4, %v961_v1 }
 0x18c   : > { %v1723_v62 = vpop.eup %1722  ;;  %v797_v63 = vmul.f32 1.442695, %v772_v60 }
 0x18d   : > { %v1725_v0 = vpop.eup %1724  ;;  %v883_v2 = vadd.f32 1.0, %v1723_v62  ;;  %v716_v3 = vpop.f32.mrf.mxu1  ;;  %v886_v14 = vmul.f32 -0.5, %v1723_v62  ;;  %v889_v20 = vand.u32 2147483647, %v1723_v62  ;;  %v1012_v27 = vsel %vm973_vm4, %v2084_v53, %v996_v16 }
 0x18e   : > { %v876_v5 = vmul.f32 0.6931472, %v1725_v0  ;;  %1726 = vpow2.f32 %v797_v63  ;;  %v2122_v7 = vadd.f32 %v2032_v30, %v716_v3 }
 0x18f   : > { %1728 = vlog2.f32 %v883_v2  ;;  %v887_v57 = vadd.f32 1.0, %v886_v14  ;;  %vm890_vm12 = vcmp.lt.f32.partialorder %v889_v20, 0.0004427343 }
 0x190   : > { %v882_v10 = vsel %vm881_vm11, %v879_v6, %v876_v5  ;;  %v757_v15 = vand.u32 2147483647, %v2122_v7 }
 0x191   : > { %v962_v17 = vadd.f32 %v882_v10, %v738_v9  ;;  %v888_v34 = vmul.f32 %v1723_v62, %v887_v57 }
 0x192   : > { %v773_v44 = vsub.f32 0.0, %v757_v15 }
 0x193   : > { %v997_v18 = vmul.f32 %v981_v11, %v962_v17  ;;  %v741_v17 = vmax.f32 %v2122_v7, 0.0 }
 0x194   : > { %v1727_v19 = vpop.eup %1726  ;;  %v799_v22 = vmul.f32 1.442695, %v773_v44 }
 0x195   : > { %v1729_v23 = vpop.eup %1728  ;;  %v892_v24 = vadd.f32 1.0, %v1727_v19  ;;  %v895_v25 = vmul.f32 -0.5, %v1727_v19  ;;  %v718_v26 = vpop.f32.mrf.mxu1  ;;  %v1013_v28 = vsel %vm973_vm4, %v2096_v13, %v997_v18  ;;  %v898_v13 = vand.u32 2147483647, %v1727_v19 }
 0x196   : > { %v885_v29 = vmul.f32 0.6931472, %v1729_v23  ;;  %1730 = vpow2.f32 %v799_v22  ;;  %v2134_v33 = vadd.f32 %v2032_v30, %v718_v26  ;;  %v1025_v21 = vpack.c.bf16 %v1013_v28, %v1012_v27  ;;  %v984_v23 = vld [vmem:[%s2057_s12 + $0x50] sm:$0xff] }
 0x197   : > { %1732 = vlog2.f32 %v892_v24  ;;  %v896_v53 = vadd.f32 1.0, %v895_v25  ;;  %vm899_vm13 = vcmp.lt.f32.partialorder %v898_v13, 0.0004427343 }
 0x198   : > { %v758_v36 = vand.u32 2147483647, %v2134_v33  ;;  %1587 = vmatmul.msk.bf16.gmra.mxu2 %vm1042_vm5, %v1025_v21  ;;  %v891_v38 = vsel %vm890_vm12, %v888_v34, %v885_v29  ;;  %v742_v27 = vmax.f32 %v2134_v33, 0.0  ;;  %v985_v29 = vld [vmem:[%s2057_s12 + $0x58] sm:$0xff] }
 0x199   : > { %v963_v37 = vadd.f32 %v891_v38, %v739_v40  ;;  %v897_v48 = vmul.f32 %v1727_v19, %v896_v53 }
 0x19a   : > { %v774_v39 = vsub.f32 0.0, %v758_v36 }
 0x19b   : > { %v998_v58 = vmul.f32 %v982_v46, %v963_v37 }
 0x19c   : > { %v1731_v32 = vpop.eup %1730  ;;  %v801_v41 = vmul.f32 1.442695, %v774_v39 }
 0x19d   : > { %v1733_v42 = vpop.eup %1732  ;;  %v901_v43 = vadd.f32 1.0, %v1731_v32  ;;  %v721_v45 = vpop.f32.mrf.mxu1  ;;  %v904_v55 = vmul.f32 -0.5, %v1731_v32  ;;  %v907_v62 = vand.u32 2147483647, %v1731_v32  ;;  %v1014_v4 = vsel %vm973_vm4, %v2103_v31, %v998_v58 }
 0x19e   : > { %v894_v47 = vmul.f32 0.6931472, %v1733_v42  ;;  %1734 = vpow2.f32 %v801_v41  ;;  %v2141_v49 = vadd.f32 %v2032_v30, %v721_v45 }
 0x19f   : > { %1736 = vlog2.f32 %v901_v43  ;;  %v905_v35 = vadd.f32 1.0, %v904_v55  ;;  %vm908_vm14 = vcmp.lt.f32.partialorder %v907_v62, 0.0004427343  ;;  %v986_v62 = vld [vmem:[%s2057_s12 + $0x60] sm:$0xff] }
 0x1a0   : > { %v900_v51 = vsel %vm899_vm13, %v897_v48, %v894_v47  ;;  %v759_v56 = vand.u32 2147483647, %v2141_v49 }
 0x1a1   : > { %v964_v59 = vadd.f32 %v900_v51, %v740_v50  ;;  %v906_v11 = vmul.f32 %v1731_v32, %v905_v35 }
 0x1a2   : > { %v775_v12 = vsub.f32 0.0, %v759_v56 }
 0x1a3   : > { %v999_v60 = vmul.f32 %v983_v52, %v964_v59 }
 0x1a4   : > { %v1735_v61 = vpop.eup %1734  ;;  %v803_v63 = vmul.f32 1.442695, %v775_v12 }
 0x1a5   : > { %v1737_v0 = vpop.eup %1736  ;;  %v910_v1 = vadd.f32 1.0, %v1735_v61  ;;  %v913_v2 = vmul.f32 -0.5, %v1735_v61  ;;  %v723_v3 = vpop.f32.mrf.mxu1  ;;  %v1015_v5 = vsel %vm973_vm4, %v2115_v54, %v999_v60  ;;  %v916_v54 = vand.u32 2147483647, %v1735_v61 }
 0x1a6   : > { %v903_v6 = vmul.f32 0.6931472, %v1737_v0  ;;  %1738 = vpow2.f32 %v803_v63  ;;  %v2153_v9 = vadd.f32 %v2032_v30, %v723_v3  ;;  %v1026_v10 = vpack.c.bf16 %v1015_v5, %v1014_v4  ;;  %v987_v3 = vld [vmem:[%s2057_s12 + $0x68] sm:$0xff] }
 0x1a7   : > { %1740 = vlog2.f32 %v910_v1  ;;  %v914_v31 = vadd.f32 1.0, %v913_v2  ;;  %vm917_vm15 = vcmp.lt.f32.partialorder %v916_v54, 0.0004427343 }
 0x1a8   : > { %v760_v14 = vand.u32 2147483647, %v2153_v9  ;;  %1588 = vmatmul.msk.bf16.gmra.mxu2 %vm1042_vm5, %v1026_v10  ;;  %v909_v15 = vsel %vm908_vm14, %v906_v11, %v903_v6  ;;  %v744_v1 = vmax.f32 %v2153_v9, 0.0 }
 0x1a9   : > { %v965_v57 = vadd.f32 %v909_v15, %v741_v17  ;;  %v915_v25 = vmul.f32 %v1735_v61, %v914_v31 }
 0x1aa   : > { %v776_v16 = vsub.f32 0.0, %v760_v14 }
 0x1ab   : > { %v1000_v36 = vmul.f32 %v984_v23, %v965_v57 }
 0x1ac   : > { %v1739_v44 = vpop.eup %1738  ;;  %v805_v18 = vmul.f32 1.442695, %v776_v16 }
 0x1ad   : > { %v1741_v19 = vpop.eup %1740  ;;  %v919_v20 = vadd.f32 1.0, %v1739_v44  ;;  %v726_v22 = vpop.f32.mrf.mxu1  ;;  %v922_v21 = vmul.f32 -0.5, %v1739_v44  ;;  %v925_v32 = vand.u32 2147483647, %v1739_v44  ;;  %v1016_v46 = vsel %vm973_vm4, %v2122_v7, %v1000_v36 }
 0x1ae   : > { %v912_v24 = vmul.f32 0.6931472, %v1741_v19  ;;  %1742 = vpow2.f32 %v805_v18  ;;  %v2160_v26 = vadd.f32 %v2032_v30, %v726_v22 }
 0x1af   : > { %1744 = vlog2.f32 %v919_v20  ;;  %v923_v13 = vadd.f32 1.0, %v922_v21  ;;  %vm926_vm0 = vcmp.lt.f32.partialorder %v925_v32, 0.0004427343  ;;  %v1644_v21 = vld [vmem:[%s2323_s8 + $0x10] sm:$0xff] }
 0x1b0   : > { %v918_v28 = vsel %vm917_vm15, %v915_v25, %v912_v24  ;;  %v761_v34 = vand.u32 2147483647, %v2160_v26  ;;  %v745_v23 = vmax.f32 %v2160_v26, 0.0 }
 0x1b1   : > { %v966_v38 = vadd.f32 %v918_v28, %v742_v27  ;;  %v924_v52 = vmul.f32 %v1739_v44, %v923_v13  ;;  %v988_v27 = vld [vmem:[%s2057_s12 + $0x70] sm:$0xff] }
 0x1b2   : > { %v777_v53 = vsub.f32 0.0, %v761_v34 }
 0x1b3   : > { %v1001_v39 = vmul.f32 %v985_v29, %v966_v38  ;;  %v989_v38 = vld [vmem:[%s2057_s12 + $0x78] sm:$0xff]  ;;  %s1394_s12 = scalar_lea.sflag [#allocation3], %s367_s20 }
 0x1b4   : > { %v1743_v40 = vpop.eup %1742  ;;  %v807_v41 = vmul.f32 1.442695, %v777_v53 }
 0x1b5   : > { %v1745_v42 = vpop.eup %1744  ;;  %v928_v37 = vadd.f32 1.0, %v1743_v40  ;;  %v931_v43 = vmul.f32 -0.5, %v1743_v40  ;;  %v728_v45 = vpop.f32.mrf.mxu1  ;;  %v1017_v47 = vsel %vm973_vm4, %v2134_v33, %v1001_v39  ;;  %v743_v33 = vmax.f32 %v2141_v49, 0.0 }
 0x1b6   : > { %v921_v48 = vmul.f32 0.6931472, %v1745_v42  ;;  %1746 = vpow2.f32 %v807_v41  ;;  %v2172_v50 = vadd.f32 %v2032_v30, %v728_v45  ;;  %v1027_v51 = vpack.c.bf16 %v1017_v47, %v1016_v46  ;;  %v2213_v45 = vld [vmem:[%s2322_s7] ss:$0 sm:$0xff] }
 0x1b7   : > { %1748 = vlog2.f32 %v928_v37  ;;  %v932_v7 = vadd.f32 1.0, %v931_v43  ;;  %v934_v59 = vand.u32 2147483647, %v1743_v40  ;;  %v1642_v37 = vld [vmem:[%s2323_s8] sm:$0xff] }
 0x1b8   : > { %v762_v55 = vand.u32 2147483647, %v2172_v50  ;;  %1589 = vmatmul.msk.bf16.gmra.mxu2 %vm1042_vm5, %v1027_v51  ;;  %v927_v56 = vsel %vm926_vm0, %v924_v52, %v921_v48  ;;  %v746_v34 = vmax.f32 %v2172_v50, 0.0 }
 0x1b9   : > { %v967_v61 = vadd.f32 %v927_v56, %v743_v33  ;;  %v933_v0 = vmul.f32 %v1743_v40, %v932_v7  ;;  %vm935_vm1 = vcmp.lt.f32.partialorder %v934_v59, 0.0004427343  ;;  %v1643_v40 = vld [vmem:[%s2323_s8 + $0x8] sm:$0xff] }
 0x1ba   : > { %v778_v58 = vsub.f32 0.0, %v762_v55 }
 0x1bb   : > { %v1002_v5 = vmul.f32 %v986_v62, %v967_v61 }
 0x1bc   : > { %v1747_v12 = vpop.eup %1746  ;;  %v809_v60 = vmul.f32 1.442695, %v778_v58 }
 0x1bd   : > { %v1749_v30 = vpop.eup %1748  ;;  %v937_v35 = vadd.f32 1.0, %v1747_v12  ;;  %v940_v4 = vmul.f32 -0.5, %v1747_v12  ;;  %v943_v31 = vand.u32 2147483647, %v1747_v12  ;;  %v1018_v17 = vsel %vm973_vm4, %v2141_v49, %v1002_v5  ;;  %v1645_v49 = vld [vmem:[%s2323_s8 + $0x18] sm:$0xff] }
 0x1be   : > { %v930_v63 = vmul.f32 0.6931472, %v1749_v30  ;;  %1750 = vpow2.f32 %v809_v60  ;;  %1236 = vmatpush.bf16.msra.mxu3 %v1645_v49 }
 0x1bf   : > { %1752 = vlog2.f32 %v937_v35  ;;  %v941_v14 = vadd.f32 1.0, %v940_v4  ;;  %vm944_vm3 = vcmp.lt.f32.partialorder %v943_v31, 0.0004427343 }
 0x1c0   : > { %v936_v2 = vsel %vm935_vm1, %v933_v0, %v930_v63 }
 0x1c1   : > { %v968_v6 = vadd.f32 %v936_v2, %v744_v1  ;;  %v942_v57 = vmul.f32 %v1747_v12, %v941_v14 }
 0x1c2   : > { %1237 = vmatpush.bf16.msra.mxu3 %v1644_v21 }
 0x1c3   : > { %v1003_v10 = vmul.f32 %v987_v3, %v968_v6 }
 0x1c4   : > { %v1751_v11 = vpop.eup %1750 }
 0x1c5   : > { %v1753_v15 = vpop.eup %1752  ;;  %v946_v16 = vadd.f32 1.0, %v1751_v11  ;;  %v1019_v54 = vsel %vm973_vm4, %v2153_v9, %v1003_v10  ;;  %v949_v18 = vmul.f32 -0.5, %v1751_v11  ;;  %v952_v24 = vand.u32 2147483647, %v1751_v11 }
 0x1c6   : > { %v939_v44 = vmul.f32 0.6931472, %v1753_v15  ;;  %v1028_v19 = vpack.c.bf16 %v1019_v54, %v1018_v17  ;;  %1238 = vmatpush.bf16.msra.mxu3 %v1643_v40 }
 0x1c7   : > { %1754 = vlog2.f32 %v946_v16  ;;  %v950_v22 = vadd.f32 1.0, %v949_v18  ;;  %vm953_vm6 = vcmp.lt.f32.partialorder %v952_v24, 0.0004427343 }
 0x1c8   : > { %1590 = vmatmul.msk.bf16.gmra.mxu2 %vm1042_vm5, %v1028_v19  ;;  %v945_v20 = vsel %vm944_vm3, %v942_v57, %v939_v44 }
 0x1c9   : > { %v969_v25 = vadd.f32 %v945_v20, %v745_v23  ;;  %v951_v29 = vmul.f32 %v1751_v11, %v950_v22 }
 0x1ca   : > { %1239 = vmatpush.bf16.msra.mxu3 %v1642_v37 }
 0x1cb   : > { %v1004_v53 = vmul.f32 %v988_v27, %v969_v25 }
 0x1cd   : > { %v1755_v9 = vpop.eup %1754  ;;  %v1020_v32 = vsel %vm973_vm4, %v2160_v26, %v1004_v53 }
 0x1ce   : > { %v948_v28 = vmul.f32 0.6931472, %v1755_v9 }
 0x1d0   : > { %v954_v36 = vsel %vm953_vm6, %v951_v29, %v948_v28 }
 0x1d1   : > { %v970_v39 = vadd.f32 %v954_v36, %v746_v34 }
 0x1d3   : > { %v1005_v13 = vmul.f32 %v989_v38, %v970_v39 }
 0x1d5   : > { %v1021_v41 = vsel %vm973_vm4, %v2172_v50, %v1005_v13 }
 0x1d6   : > { %v1029_v42 = vpack.c.bf16 %v1021_v41, %v1020_v32 }
 0x1d8   : > { %1591 = vmatmul.msk.bf16.gmra.mxu2 %vm1042_vm5, %v1029_v42 }
 0x1eb   : > { %v1076_v43 = vpop.f32.mrf.mxu2 }
 0x1ec   : > { %v1077_v26 = vadd.f32 %v2213_v45, %v1076_v43 }
 0x1ee   : > { %v1132_v47 = vmul.f32 0.01, %v1077_v26  ;;  %vm1116_vm4 = vcmp.gt.f32.partialorder %v1077_v26, 0.0 }
 0x1f0   : > { %v1148_v50 = vsel %vm1116_vm4, %v1077_v26, %v1132_v47 }
 0x1f3   : > { %v1078_v46 = vpop.f32.mrf.mxu2 }
 0x1f4   : > { %v1079_v8 = vadd.f32 %v2213_v45, %v1078_v46 }
 0x1f6   : > { %vm1117_vm7 = vcmp.gt.f32.partialorder %v1079_v8, 0.0  ;;  %v1133_v48 = vmul.f32 0.01, %v1079_v8 }
 0x1f8   : > { %v1149_v51 = vsel %vm1117_vm7, %v1079_v8, %v1133_v48 }
 0x1f9   : > { %v1164_v52 = vpack.c.bf16 %v1149_v51, %v1148_v50 }
 0x1fb   : > { %v1081_v55 = vpop.f32.mrf.mxu2  ;;  %1608 = vmatmul.msk.bf16.vlgmr.msra.gmra.mxu3 %vm657_vm2, %v1164_v52 }
 0x1fc   : > { %v1082_v56 = vadd.f32 %v2213_v45, %v1081_v55  ;;  %v2242_v55 = vld [vmem:[%s2324_s9] ss:$0 sm:$0xff] }
 0x1fe   : > { %v1134_v58 = vmul.f32 0.01, %v1082_v56  ;;  %vm1118_vm5 = vcmp.gt.f32.partialorder %v1082_v56, 0.0 }
 0x200   : > { %v1150_v12 = vsel %vm1118_vm5, %v1082_v56, %v1134_v58 }
 0x203   : > { %v1083_v7 = vpop.f32.mrf.mxu2 }
 0x204   : > { %v1084_v33 = vadd.f32 %v2213_v45, %v1083_v7 }
 0x206   : > { %vm1119_vm8 = vcmp.gt.f32.partialorder %v1084_v33, 0.0  ;;  %v1135_v59 = vmul.f32 0.01, %v1084_v33 }
 0x208   : > { %v1151_v60 = vsel %vm1119_vm8, %v1084_v33, %v1135_v59 }
 0x209   : > { %v1165_v30 = vpack.c.bf16 %v1151_v60, %v1150_v12 }
 0x20b   : > { %v1086_v61 = vpop.f32.mrf.mxu2  ;;  %1609 = vmatmul.msk.bf16.gmra.mxu3 %vm657_vm2, %v1165_v30 }
 0x20c   : > { %v1087_v35 = vadd.f32 %v2213_v45, %v1086_v61 }
 0x20e   : > { %v1136_v63 = vmul.f32 0.01, %v1087_v35  ;;  %vm1120_vm9 = vcmp.gt.f32.partialorder %v1087_v35, 0.0 }
 0x210   : > { %v1152_v2 = vsel %vm1120_vm9, %v1087_v35, %v1136_v63 }
 0x213   : > { %v1088_v62 = vpop.f32.mrf.mxu2 }
 0x214   : > { %v1089_v0 = vadd.f32 %v2213_v45, %v1088_v62 }
 0x216   : > { %vm1121_vm10 = vcmp.gt.f32.partialorder %v1089_v0, 0.0  ;;  %v1137_v1 = vmul.f32 0.01, %v1089_v0 }
 0x218   : > { %v1153_v3 = vsel %vm1121_vm10, %v1089_v0, %v1137_v1 }
 0x219   : > { %v1166_v4 = vpack.c.bf16 %v1153_v3, %v1152_v2 }
 0x21b   : > { %v1091_v5 = vpop.f32.mrf.mxu2  ;;  %1610 = vmatmul.msk.bf16.gmra.mxu3 %vm657_vm2, %v1166_v4 }
 0x21c   : > { %v1092_v6 = vadd.f32 %v2213_v45, %v1091_v5 }
 0x21e   : > { %v1138_v11 = vmul.f32 0.01, %v1092_v6  ;;  %vm1122_vm11 = vcmp.gt.f32.partialorder %v1092_v6, 0.0 }
 0x220   : > { %v1154_v31 = vsel %vm1122_vm11, %v1092_v6, %v1138_v11 }
 0x223   : > { %v1093_v10 = vpop.f32.mrf.mxu2 }
 0x224   : > { %v1094_v14 = vadd.f32 %v2213_v45, %v1093_v10 }
 0x226   : > { %vm1123_vm12 = vcmp.gt.f32.partialorder %v1094_v14, 0.0  ;;  %v1139_v15 = vmul.f32 0.01, %v1094_v14 }
 0x228   : > { %v1155_v16 = vsel %vm1123_vm12, %v1094_v14, %v1139_v15 }
 0x229   : > { %v1167_v17 = vpack.c.bf16 %v1155_v16, %v1154_v31 }
 0x22b   : > { %v1096_v54 = vpop.f32.mrf.mxu2  ;;  %1611 = vmatmul.msk.bf16.gmra.mxu3 %vm657_vm2, %v1167_v17 }
 0x22c   : > { %v1097_v44 = vadd.f32 %v2213_v45, %v1096_v54 }
 0x22e   : > { %v1140_v19 = vmul.f32 0.01, %v1097_v44  ;;  %vm1124_vm13 = vcmp.gt.f32.partialorder %v1097_v44, 0.0 }
 0x230   : > { %v1156_v22 = vsel %vm1124_vm13, %v1097_v44, %v1140_v19 }
 0x233   : > { %v1098_v18 = vpop.f32.mrf.mxu2 }
 0x234   : > { %v1099_v57 = vadd.f32 %v2213_v45, %v1098_v18 }
 0x236   : > { %vm1125_vm14 = vcmp.gt.f32.partialorder %v1099_v57, 0.0  ;;  %v1141_v20 = vmul.f32 0.01, %v1099_v57 }
 0x238   : > { %v1157_v49 = vsel %vm1125_vm14, %v1099_v57, %v1141_v20 }
 0x239   : > { %v1168_v23 = vpack.c.bf16 %v1157_v49, %v1156_v22 }
 0x23b   : > { %v1101_v24 = vpop.f32.mrf.mxu2  ;;  %1612 = vmatmul.msk.bf16.gmra.mxu3 %vm657_vm2, %v1168_v23 }
 0x23c   : > { %v1102_v9 = vadd.f32 %v2213_v45, %v1101_v24 }
 0x23e   : > { %v1142_v27 = vmul.f32 0.01, %v1102_v9  ;;  %vm1126_vm15 = vcmp.gt.f32.partialorder %v1102_v9, 0.0 }
 0x240   : > { %v1158_v21 = vsel %vm1126_vm15, %v1102_v9, %v1142_v27 }
 0x243   : > { %v1103_v25 = vpop.f32.mrf.mxu2 }
 0x244   : > { %v1104_v28 = vadd.f32 %v2213_v45, %v1103_v25 }
 0x246   : > { %vm1127_vm0 = vcmp.gt.f32.partialorder %v1104_v28, 0.0  ;;  %v1143_v29 = vmul.f32 0.01, %v1104_v28 }
 0x248   : > { %v1159_v34 = vsel %vm1127_vm0, %v1104_v28, %v1143_v29 }
 0x249   : > { %v1169_v36 = vpack.c.bf16 %v1159_v34, %v1158_v21 }
 0x24b   : > { %v1106_v38 = vpop.f32.mrf.mxu2  ;;  %1613 = vmatmul.msk.bf16.gmra.mxu3 %vm657_vm2, %v1169_v36 }
 0x24c   : > { %v1107_v53 = vadd.f32 %v2213_v45, %v1106_v38 }
 0x24e   : > { %v1144_v40 = vmul.f32 0.01, %v1107_v53  ;;  %vm1128_vm1 = vcmp.gt.f32.partialorder %v1107_v53, 0.0 }
 0x250   : > { %v1160_v41 = vsel %vm1128_vm1, %v1107_v53, %v1144_v40 }
 0x253   : > { %v1108_v39 = vpop.f32.mrf.mxu2 }
 0x254   : > { %v1109_v13 = vadd.f32 %v2213_v45, %v1108_v39 }
 0x256   : > { %vm1129_vm3 = vcmp.gt.f32.partialorder %v1109_v13, 0.0  ;;  %v1145_v32 = vmul.f32 0.01, %v1109_v13 }
 0x258   : > { %v1161_v42 = vsel %vm1129_vm3, %v1109_v13, %v1145_v32 }
 0x259   : > { %v1170_v37 = vpack.c.bf16 %v1161_v42, %v1160_v41 }
 0x25b   : > { %v1111_v43 = vpop.f32.mrf.mxu2  ;;  %1614 = vmatmul.msk.bf16.gmra.mxu3 %vm657_vm2, %v1170_v37 }
 0x25c   : > { %v1112_v26 = vadd.f32 %v2213_v45, %v1111_v43 }
 0x25e   : > { %v1146_v47 = vmul.f32 0.01, %v1112_v26  ;;  %vm1130_vm6 = vcmp.gt.f32.partialorder %v1112_v26, 0.0 }
 0x260   : > { %v1162_v50 = vsel %vm1130_vm6, %v1112_v26, %v1146_v47 }
 0x263   : > { %v1113_v46 = vpop.f32.mrf.mxu2 }
 0x264   : > { %v1114_v8 = vadd.f32 %v2213_v45, %v1113_v46 }
 0x266   : > { %vm1131_vm4 = vcmp.gt.f32.partialorder %v1114_v8, 0.0  ;;  %v1147_v48 = vmul.f32 0.01, %v1114_v8 }
 0x268   : > { %v1163_v51 = vsel %vm1131_vm4, %v1114_v8, %v1147_v48 }
 0x269   : > { %v1171_v52 = vpack.c.bf16 %v1163_v51, %v1162_v50 }
 0x26b   : > { %1615 = vmatmul.msk.bf16.gmra.mxu3 %vm657_vm2, %v1171_v52 }
 0x27e   : > { %v1241_v56 = vpop.f32.mrf.mxu3 }
 0x27f   : > { %v1242_v7 = vadd.f32 %v2242_v55, %v1241_v56 }
 0x281   : > { %v1281_v58 = vmul.f32 0.5, %v1242_v7 }
 0x283   : > { %1756 = vtanh.f32 %v1281_v58 }
 0x286   : > { %v1243_v45 = vpop.f32.mrf.mxu3 }
 0x287   : > { %v1244_v33 = vadd.f32 %v2242_v55, %v1243_v45 }
 0x289   : > { %v1757_v59 = vpop.eup %1756  ;;  %v1282_v12 = vmul.f32 0.5, %v1244_v33 }
 0x28a   : > { %v1313_v60 = vmul.f32 0.5, %v1757_v59 }
 0x28b   : > { %1758 = vtanh.f32 %v1282_v12 }
 0x28c   : > { %v1329_v30 = vadd.f32 0.5, %v1313_v60 }
 0x28e   : > { %v1345_v61 = vmax.f32 %v1329_v30, 0.01  ;;  %v1246_v35 = vpop.f32.mrf.mxu3 }
 0x28f   : > { %v1247_v62 = vadd.f32 %v2242_v55, %v1246_v35 }
 0x290   : > { %v1361_v63 = vmin.f32 %v1345_v61, 0.99 }
 0x291   : > { %v1759_v0 = vpop.eup %1758  ;;  %v1283_v1 = vmul.f32 0.5, %v1247_v62 }
 0x292   : > { %1377 = vst [vmem:[%s2250_s21] sm:$0xff] %v1361_v63  ;;  %v1314_v2 = vmul.f32 0.5, %v1759_v0 }
 0x293   : > { %1760 = vtanh.f32 %v1283_v1 }
 0x294   : > { %v1330_v3 = vadd.f32 0.5, %v1314_v2 }
 0x296   : > { %v1346_v4 = vmax.f32 %v1330_v3, 0.01  ;;  %v1248_v5 = vpop.f32.mrf.mxu3 }
 0x297   : > { %v1249_v6 = vadd.f32 %v2242_v55, %v1248_v5 }
 0x298   : > { %v1362_v10 = vmin.f32 %v1346_v4, 0.99 }
 0x299   : > { %v1761_v11 = vpop.eup %1760  ;;  %v1284_v14 = vmul.f32 0.5, %v1249_v6 }
 0x29a   : > { %1378 = vst [vmem:[%s2250_s21 + $0x8] sm:$0xff] %v1362_v10  ;;  %v1315_v15 = vmul.f32 0.5, %v1761_v11 }
 0x29b   : > { %1762 = vtanh.f32 %v1284_v14 }
 0x29c   : > { %v1331_v31 = vadd.f32 0.5, %v1315_v15 }
 0x29e   : > { %v1347_v16 = vmax.f32 %v1331_v31, 0.01  ;;  %v1251_v17 = vpop.f32.mrf.mxu3 }
 0x29f   : > { %v1252_v54 = vadd.f32 %v2242_v55, %v1251_v17 }
 0x2a0   : > { %v1363_v44 = vmin.f32 %v1347_v16, 0.99 }
 0x2a1   : > { %v1763_v18 = vpop.eup %1762  ;;  %v1285_v19 = vmul.f32 0.5, %v1252_v54 }
 0x2a2   : > { %1379 = vst [vmem:[%s2250_s21 + $0x10] sm:$0xff] %v1363_v44  ;;  %v1316_v57 = vmul.f32 0.5, %v1763_v18 }
 0x2a3   : > { %1764 = vtanh.f32 %v1285_v19 }
 0x2a4   : > { %v1332_v20 = vadd.f32 0.5, %v1316_v57 }
 0x2a6   : > { %v1348_v22 = vmax.f32 %v1332_v20, 0.01  ;;  %v1253_v49 = vpop.f32.mrf.mxu3 }
 0x2a7   : > { %v1254_v23 = vadd.f32 %v2242_v55, %v1253_v49 }
 0x2a8   : > { %v1364_v24 = vmin.f32 %v1348_v22, 0.99 }
 0x2a9   : > { %v1765_v9 = vpop.eup %1764  ;;  %v1286_v25 = vmul.f32 0.5, %v1254_v23 }
 0x2aa   : > { %1380 = vst [vmem:[%s2250_s21 + $0x18] sm:$0xff] %v1364_v24  ;;  %v1317_v27 = vmul.f32 0.5, %v1765_v9 }
 0x2ab   : > { %1766 = vtanh.f32 %v1286_v25 }
 0x2ac   : > { %v1333_v28 = vadd.f32 0.5, %v1317_v27 }
 0x2ae   : > { %v1349_v29 = vmax.f32 %v1333_v28, 0.01  ;;  %v1256_v21 = vpop.f32.mrf.mxu3 }
 0x2af   : > { %v1257_v34 = vadd.f32 %v2242_v55, %v1256_v21 }
 0x2b0   : > { %v1365_v36 = vmin.f32 %v1349_v29, 0.99 }
 0x2b1   : > { %v1767_v38 = vpop.eup %1766  ;;  %v1287_v53 = vmul.f32 0.5, %v1257_v34 }
 0x2b2   : > { %1381 = vst [vmem:[%s2250_s21 + $0x20] sm:$0xff] %v1365_v36  ;;  %v1318_v39 = vmul.f32 0.5, %v1767_v38 }
 0x2b3   : > { %1768 = vtanh.f32 %v1287_v53 }
 0x2b4   : > { %v1334_v40 = vadd.f32 0.5, %v1318_v39 }
 0x2b6   : > { %v1350_v13 = vmax.f32 %v1334_v40, 0.01  ;;  %v1258_v32 = vpop.f32.mrf.mxu3 }
 0x2b7   : > { %v1259_v41 = vadd.f32 %v2242_v55, %v1258_v32 }
 0x2b8   : > { %v1366_v42 = vmin.f32 %v1350_v13, 0.99 }
 0x2b9   : > { %v1769_v37 = vpop.eup %1768  ;;  %v1288_v43 = vmul.f32 0.5, %v1259_v41 }
 0x2ba   : > { %1382 = vst [vmem:[%s2250_s21 + $0x28] sm:$0xff] %v1366_v42  ;;  %v1319_v26 = vmul.f32 0.5, %v1769_v37 }
 0x2bb   : > { %1770 = vtanh.f32 %v1288_v43 }
 0x2bc   : > { %v1335_v46 = vadd.f32 0.5, %v1319_v26 }
 0x2be   : > { %v1351_v47 = vmax.f32 %v1335_v46, 0.01  ;;  %v1261_v8 = vpop.f32.mrf.mxu3 }
 0x2bf   : > { %v1262_v48 = vadd.f32 %v2242_v55, %v1261_v8 }
 0x2c0   : > { %v1367_v50 = vmin.f32 %v1351_v47, 0.99 }
 0x2c1   : > { %v1771_v51 = vpop.eup %1770  ;;  %v1289_v52 = vmul.f32 0.5, %v1262_v48 }
 0x2c2   : > { %1383 = vst [vmem:[%s2250_s21 + $0x30] sm:$0xff] %v1367_v50  ;;  %v1320_v56 = vmul.f32 0.5, %v1771_v51 }
 0x2c3   : > { %1772 = vtanh.f32 %v1289_v52 }
 0x2c4   : > { %v1336_v7 = vadd.f32 0.5, %v1320_v56 }
 0x2c6   : > { %v1352_v58 = vmax.f32 %v1336_v7, 0.01  ;;  %v1263_v45 = vpop.f32.mrf.mxu3 }
 0x2c7   : > { %v1264_v33 = vadd.f32 %v2242_v55, %v1263_v45 }
 0x2c8   : > { %v1368_v59 = vmin.f32 %v1352_v58, 0.99 }
 0x2c9   : > { %v1773_v12 = vpop.eup %1772  ;;  %v1290_v60 = vmul.f32 0.5, %v1264_v33 }
 0x2ca   : > { %1384 = vst [vmem:[%s2250_s21 + $0x38] sm:$0xff] %v1368_v59  ;;  %v1321_v30 = vmul.f32 0.5, %v1773_v12 }
 0x2cb   : > { %1774 = vtanh.f32 %v1290_v60 }
 0x2cc   : > { %v1337_v61 = vadd.f32 0.5, %v1321_v30 }
 0x2ce   : > { %v1353_v35 = vmax.f32 %v1337_v61, 0.01  ;;  %v1266_v62 = vpop.f32.mrf.mxu3 }
 0x2cf   : > { %v1267_v63 = vadd.f32 %v2242_v55, %v1266_v62 }
 0x2d0   : > { %v1369_v0 = vmin.f32 %v1353_v35, 0.99 }
 0x2d1   : > { %v1775_v1 = vpop.eup %1774  ;;  %v1291_v2 = vmul.f32 0.5, %v1267_v63 }
 0x2d2   : > { %1385 = vst [vmem:[%s2250_s21 + $0x40] sm:$0xff] %v1369_v0  ;;  %v1322_v3 = vmul.f32 0.5, %v1775_v1 }
 0x2d3   : > { %1776 = vtanh.f32 %v1291_v2 }
 0x2d4   : > { %v1338_v4 = vadd.f32 0.5, %v1322_v3 }
 0x2d6   : > { %v1354_v5 = vmax.f32 %v1338_v4, 0.01  ;;  %v1268_v6 = vpop.f32.mrf.mxu3 }
 0x2d7   : > { %v1269_v10 = vadd.f32 %v2242_v55, %v1268_v6 }
 0x2d8   : > { %v1370_v11 = vmin.f32 %v1354_v5, 0.99 }
 0x2d9   : > { %v1777_v14 = vpop.eup %1776  ;;  %v1292_v15 = vmul.f32 0.5, %v1269_v10 }
 0x2da   : > { %1386 = vst [vmem:[%s2250_s21 + $0x48] sm:$0xff] %v1370_v11  ;;  %v1323_v31 = vmul.f32 0.5, %v1777_v14 }
 0x2db   : > { %1778 = vtanh.f32 %v1292_v15 }
 0x2dc   : > { %v1339_v16 = vadd.f32 0.5, %v1323_v31 }
 0x2de   : > { %v1355_v17 = vmax.f32 %v1339_v16, 0.01  ;;  %v1271_v54 = vpop.f32.mrf.mxu3 }
 0x2df   : > { %v1272_v44 = vadd.f32 %v2242_v55, %v1271_v54 }
 0x2e0   : > { %v1371_v18 = vmin.f32 %v1355_v17, 0.99 }
 0x2e1   : > { %v1779_v19 = vpop.eup %1778  ;;  %v1293_v57 = vmul.f32 0.5, %v1272_v44 }
 0x2e2   : > { %1387 = vst [vmem:[%s2250_s21 + $0x50] sm:$0xff] %v1371_v18  ;;  %v1324_v20 = vmul.f32 0.5, %v1779_v19 }
 0x2e3   : > { %1780 = vtanh.f32 %v1293_v57 }
 0x2e4   : > { %v1340_v22 = vadd.f32 0.5, %v1324_v20 }
 0x2e6   : > { %v1356_v49 = vmax.f32 %v1340_v22, 0.01  ;;  %v1273_v23 = vpop.f32.mrf.mxu3 }
 0x2e7   : > { %v1274_v24 = vadd.f32 %v2242_v55, %v1273_v23 }
 0x2e8   : > { %v1372_v9 = vmin.f32 %v1356_v49, 0.99 }
 0x2e9   : > { %v1781_v25 = vpop.eup %1780  ;;  %v1294_v27 = vmul.f32 0.5, %v1274_v24 }
 0x2ea   : > { %1388 = vst [vmem:[%s2250_s21 + $0x58] sm:$0xff] %v1372_v9  ;;  %v1325_v28 = vmul.f32 0.5, %v1781_v25 }
 0x2eb   : > { %1782 = vtanh.f32 %v1294_v27 }
 0x2ec   : > { %v1341_v29 = vadd.f32 0.5, %v1325_v28 }
 0x2ee   : > { %v1357_v21 = vmax.f32 %v1341_v29, 0.01  ;;  %v1276_v34 = vpop.f32.mrf.mxu3 }
 0x2ef   : > { %v1277_v36 = vadd.f32 %v2242_v55, %v1276_v34 }
 0x2f0   : > { %v1373_v38 = vmin.f32 %v1357_v21, 0.99 }
 0x2f1   : > { %v1783_v53 = vpop.eup %1782  ;;  %v1295_v39 = vmul.f32 0.5, %v1277_v36 }
 0x2f2   : > { %1389 = vst [vmem:[%s2250_s21 + $0x60] sm:$0xff] %v1373_v38  ;;  %v1326_v40 = vmul.f32 0.5, %v1783_v53 }
 0x2f3   : > { %1784 = vtanh.f32 %v1295_v39 }
 0x2f4   : > { %v1342_v13 = vadd.f32 0.5, %v1326_v40 }
 0x2f6   : > { %v1358_v32 = vmax.f32 %v1342_v13, 0.01  ;;  %v1278_v41 = vpop.f32.mrf.mxu3 }
 0x2f7   : > { %v1279_v42 = vadd.f32 %v2242_v55, %v1278_v41 }
 0x2f8   : > { %v1374_v37 = vmin.f32 %v1358_v32, 0.99 }
 0x2f9   : > { %v1785_v43 = vpop.eup %1784  ;;  %v1296_v26 = vmul.f32 0.5, %v1279_v42 }
 0x2fa   : > { %1390 = vst [vmem:[%s2250_s21 + $0x68] sm:$0xff] %v1374_v37  ;;  %v1327_v46 = vmul.f32 0.5, %v1785_v43 }
 0x2fb   : > { %1786 = vtanh.f32 %v1296_v26 }
 0x2fc   : > { %v1343_v47 = vadd.f32 0.5, %v1327_v46 }
 0x2fe   : > { %v1359_v8 = vmax.f32 %v1343_v47, 0.01 }
 0x300   : > { %v1375_v48 = vmin.f32 %v1359_v8, 0.99 }
 0x301   : > { %v1787_v50 = vpop.eup %1786 }
 0x302   : > { %1391 = vst [vmem:[%s2250_s21 + $0x70] sm:$0xff] %v1375_v48  ;;  %v1328_v55 = vmul.f32 0.5, %v1787_v50 }
 0x304   : > { %v1344_v51 = vadd.f32 0.5, %v1328_v55 }
 0x306   : > { %v1360_v52 = vmax.f32 %v1344_v51, 0.01 }
 0x308   : > { %v1376_v56 = vmin.f32 %v1360_v52, 0.99 }
 0x30a   : > { %1392 = vst [vmem:[%s2250_s21 + $0x78] sm:$0xff] %v1376_v56 }
 0x30b   : > { %1815 = shalt.err (!%p1812_p3)
}
 0x30c   : > { %s1852_s20 = smov 128   ;;  %s1853_s21 = smov 8  }
 0x30d   : > { %1647 = dma.vmem_to_hbm [thread:$0]  (%p1947_p5), %s1407_s30, 2048, %s1409_s11, %s1394_s12, %s1852_s20, %s1852_s20, %s1853_s21  }
 0x30e PF: > { %p1653_p4 = scmp.ge.s32.totalorder %s1850_s16, 2  ;;  %s1423_s25 = sand.u32 1, %s1838_s13  }
 0x30f   : > { %s1424_s26 = scalar_lea.sflag [#allocation3], %s1423_s25 }
 0x310   : > { %p1650_p7 = pnand %p1653_p4, %p1951_p6 }
 0x312   : > { %p1651_p8 = pneg %p1650_p7 }
 0x314   : > { %1833 = dma.done.wait (%p1651_p8), %s1424_s26, 2048  }
 0x315   : > { %1835 = vsyncadd (%p1651_p8), %s1424_s26, 4294965248  ;;  %p20_p9 = scmp.ge.s32.totalorder %s1934_s19, 4   ;;  %s2328_s13 = smov %s1842_s14 }
 0x316   : > { %s2329_s14 = smov %s1846_s15  ;;  %s2330_s15 = smov %s1945_s22 }
 0x317   : > { %s2331_s16 = smov %s1934_s19  ;;  %22 = sbr.rel (!%p20_p9) target bundleno = 3 (0x3), region = 98 }
 0x31c   :  { %1430 = vsyncpa [#allocation3], 1 }
 0x31d   :  { %1432 = vsyncpa [#allocation3 + $0x1], 1 }

</bundles_post_ra>
